<compile_context>
chip_gen: v7x
topology: tpu7x:2x2x1
jax: 0.10.0
libtpu: 0.0.40
codegen_flags: <defaults>
</compile_context>

<pallas_src>
import functools
import math

import jax
import jax.numpy as jnp
from jax.experimental import pallas as pl
from jax.experimental.pallas import tpu as pltpu


def _round_up(n, m):
    return (n + m - 1) // m * m


def _signed_one_hot_block(idx, sgn, jstep, tk, tp, c):
    """Build W[tk, tp] with W[r, col] = sum_k sgn[r, k] * (idx[r, k] == col + jstep*tp)."""
    # Shift the (tk, c) index tile instead of the (tk, tp) iota (few vregs vs full tile).
    idx_local = idx - jstep * tp                                   # (tk, c) int32
    col_ids = jax.lax.broadcasted_iota(jnp.int32, (tk, tp), 1)     # (tk, tp)
    w = jnp.where(col_ids == idx_local[:, 0:1], sgn[:, 0:1], jnp.float32(0.0))
    for kk in range(1, c):
        w = w + jnp.where(col_ids == idx_local[:, kk:kk + 1], sgn[:, kk:kk + 1],
                          jnp.float32(0.0))
    return w                                                       # (tk, tp) f32


def _sjlt_fused_kernel(x_ref, idx_ref, sign_ref, o_ref, *, c, tk, tp, norm,
                       matmul_dtype):
    # x_ref    : (tb, tk)  matmul_dtype  -- input tile
    # idx_ref  : (tk, c)   int32         -- this k-tile of the index table
    # sign_ref : (tk, c)   f32           -- +/-1 signs (0 rows for D padding)
    # o_ref    : (tb, tp)  f32           -- resident across k axis -> accumulator
    jstep = pl.program_id(1)
    kstep = pl.program_id(2)

    @pl.when(kstep == 0)
    def _():
        o_ref[...] = jnp.zeros_like(o_ref)

    w = _signed_one_hot_block(idx_ref[...], sign_ref[...], jstep, tk, tp, c)
    o_ref[...] += jnp.dot(x_ref[...], w.astype(matmul_dtype),
                          preferred_element_type=jnp.float32)

    @pl.when(kstep == pl.num_programs(2) - 1)
    def _():
        o_ref[...] = o_ref[...] * jnp.float32(norm)


def _build_s_kernel(idx_ref, sign_ref, s_ref, *, c, tk, tp):
    # Materialize one (tk, tp) block of the dense projection matrix S (entries +/-1).
    jstep = pl.program_id(1)
    w = _signed_one_hot_block(idx_ref[...], sign_ref[...], jstep, tk, tp, c)
    s_ref[...] = w.astype(s_ref.dtype)


def _matmul_kernel(x_ref, s_ref, o_ref, *, norm):
    kstep = pl.program_id(2)

    @pl.when(kstep == 0)
    def _():
        o_ref[...] = jnp.zeros_like(o_ref)

    o_ref[...] += jnp.dot(x_ref[...], s_ref[...],
                          preferred_element_type=jnp.float32)

    @pl.when(kstep == pl.num_programs(2) - 1)
    def _():
        o_ref[...] = o_ref[...] * jnp.float32(norm)


def sjlt_projection(x, rand_indices, rand_signs, proj_dim, c, *,
                    tb=512, tk=256, tp=512,
                    matmul_dtype=jnp.bfloat16, use_precomputed_s=None):
    """SJLT forward.  x: [B, D]; rand_indices/rand_signs: [D, c]."""
    B, D = x.shape
    assert rand_indices.shape == (D, c) and rand_signs.shape == (D, c)
    norm = 1.0 / math.sqrt(c)

    # Clamp tiles to the (padded) problem size; keep (8, 128) alignment.
    tb = min(tb, _round_up(B, 8))
    tk = min(tk, _round_up(D, 128))
    tp = min(tp, _round_up(proj_dim, 128))
    B_pad = _round_up(B, tb)
    D_pad = _round_up(D, tk)
    P_pad = _round_up(proj_dim, tp)

    if use_precomputed_s is None:
        # Many batch tiles -> the fused path would rebuild W (B/tb)*(P/tp) times;
        # materialize dense S once and run a plain MXU matmul instead.
        use_precomputed_s = (B_pad // tb) >= 4

    idx_i32 = rand_indices.astype(jnp.int32)
    signs_f = rand_signs.astype(jnp.float32)          # exactly +/-1
    if D_pad != D:
        # Padded rows get sign 0 -> contribute nothing (index 0 hits column 0 harmlessly).
        idx_i32 = jnp.pad(idx_i32, ((0, D_pad - D), (0, 0)))
        signs_f = jnp.pad(signs_f, ((0, D_pad - D), (0, 0)))

    x_p = x.astype(matmul_dtype)
    if B_pad != B or D_pad != D:
        x_p = jnp.pad(x_p, ((0, B_pad - B), (0, D_pad - D)))

    flops = 2 * B_pad * D_pad * P_pad
    x_bytes = B_pad * D_pad * x_p.dtype.itemsize
    out_bytes = B_pad * P_pad * 4
    tbl_bytes = D_pad * c * 8

    if use_precomputed_s:
        # Step 1: scatter the sparse projection into dense S (entries +/-1) once.
        s = pl.pallas_call(
            functools.partial(_build_s_kernel, c=c, tk=tk, tp=tp),
            out_shape=jax.ShapeDtypeStruct((D_pad, P_pad), matmul_dtype),
            grid_spec=pltpu.PrefetchScalarGridSpec(
                num_scalar_prefetch=0,
                grid=(D_pad // tk, P_pad // tp),
                in_specs=[
                    pl.BlockSpec((tk, c), lambda i, j: (i, 0)),
                    pl.BlockSpec((tk, c), lambda i, j: (i, 0)),
                ],
                out_specs=pl.BlockSpec((tk, tp), lambda i, j: (i, j)),
            ),
            compiler_params=pltpu.CompilerParams(
                dimension_semantics=("parallel", "parallel")),
        )(idx_i32, signs_f)

        # Step 2: plain tiled bf16 MXU matmul, accumulate in the resident output block.
        out = pl.pallas_call(
            functools.partial(_matmul_kernel, norm=norm),
            out_shape=jax.ShapeDtypeStruct((B_pad, P_pad), jnp.float32),
            grid_spec=pltpu.PrefetchScalarGridSpec(
                num_scalar_prefetch=0,
                grid=(B_pad // tb, P_pad // tp, D_pad // tk),
                in_specs=[
                    pl.BlockSpec((tb, tk), lambda i, j, k: (i, k)),
                    pl.BlockSpec((tk, tp), lambda i, j, k: (k, j)),
                ],
                out_specs=pl.BlockSpec((tb, tp), lambda i, j, k: (i, j)),
            ),
            compiler_params=pltpu.CompilerParams(
                dimension_semantics=("parallel", "parallel", "arbitrary")),
            cost_estimate=pl.CostEstimate(
                flops=flops, transcendentals=0,
                bytes_accessed=(x_bytes * (P_pad // tp) + out_bytes +
                                D_pad * P_pad * x_p.dtype.itemsize * (B_pad // tb))),
        )(x_p, s)
    else:
        out = pl.pallas_call(
            functools.partial(_sjlt_fused_kernel, c=c, tk=tk, tp=tp,
                              norm=norm, matmul_dtype=matmul_dtype),
            out_shape=jax.ShapeDtypeStruct((B_pad, P_pad), jnp.float32),
            grid_spec=pltpu.PrefetchScalarGridSpec(
                num_scalar_prefetch=0,
                grid=(B_pad // tb, P_pad // tp, D_pad // tk),
                in_specs=[
                    pl.BlockSpec((tb, tk), lambda i, j, k: (i, k)),   # x tile
                    pl.BlockSpec((tk, c), lambda i, j, k: (k, 0)),    # idx k-tile
                    pl.BlockSpec((tk, c), lambda i, j, k: (k, 0)),    # sign k-tile
                ],
                out_specs=pl.BlockSpec((tb, tp), lambda i, j, k: (i, j)),
            ),
            compiler_params=pltpu.CompilerParams(
                dimension_semantics=("parallel", "parallel", "arbitrary")),
            cost_estimate=pl.CostEstimate(
                flops=flops, transcendentals=0,
                bytes_accessed=(x_bytes * (P_pad // tp) + out_bytes +
                                tbl_bytes * (B_pad // tb) * (P_pad // tp))),
        )(x_p, idx_i32, signs_f)

    return out[:B, :proj_dim].astype(x.dtype)


def sjlt_reference(x, rand_indices, rand_signs, proj_dim, c):
    """Pure-JAX reference: dense scatter of the sparse projection matrix."""
    one_hot = jax.nn.one_hot(rand_indices, proj_dim, dtype=jnp.float32)   # (D, c, P)
    S = jnp.sum(one_hot * rand_signs.astype(jnp.float32)[..., None], axis=1)
    return (x.astype(jnp.float32) @ S) * (1.0 / math.sqrt(c))


if __name__ == "__main__":
    # Small shapes consistent with the module: [batch, original_dim] -> [batch, proj_dim].
    batch, original_dim, proj_dim, c = 8, 256, 128, 4

    key = jax.random.PRNGKey(0)
    kx, ki, ks = jax.random.split(key, 3)

    x = jax.random.normal(kx, (batch, original_dim), dtype=jnp.float32)
    # Deterministic "buffers" matching the module's __init__ shapes.
    rand_indices = jax.random.randint(
        ki, (original_dim, c), 0, proj_dim, dtype=jnp.int32)
    rand_signs = (jax.random.randint(ks, (original_dim, c), 0, 2, dtype=jnp.int32)
                  * 2 - 1).astype(jnp.int8)

    # TODO(synk): CUDA launch params (threads, fixed_blocks) have no TPU meaning;
    # tiling is controlled by tb/tk/tp instead.
    y_ref = sjlt_reference(x, rand_indices, rand_signs, proj_dim, c)

    # 1) Exactness check of the kernel logic (f32 MXU path, fused).
    y_f32 = jax.block_until_ready(
        sjlt_projection(x, rand_indices, rand_signs, proj_dim, c,
                        matmul_dtype=jnp.float32, use_precomputed_s=False))
    assert y_f32.shape == (batch, proj_dim)
    assert jnp.allclose(y_f32, y_ref, atol=1e-4, rtol=1e-4), "f32 fused mismatch"

    # 2) Default fast path: bf16 MXU, fused W build (tolerance loosened for bf16 x).
    y_bf16 = jax.block_until_ready(
        sjlt_projection(x, rand_indices, rand_signs, proj_dim, c))
    assert y_bf16.shape == (batch, proj_dim)
    assert jnp.allclose(y_bf16, y_ref, atol=3e-2, rtol=3e-2), "bf16 fused mismatch"

    # 3) Precomputed-S path (the one large batches pick automatically).
    y_pre = jax.block_until_ready(
        sjlt_projection(x, rand_indices, rand_signs, proj_dim, c,
                        use_precomputed_s=True))
    assert jnp.allclose(y_pre, y_ref, atol=3e-2, rtol=3e-2), "precomputed-S mismatch"

    print("KERNEL_OK")
</pallas_src>

<mosaic_0001>
module attributes {stable_mosaic.version = 11 : i64} {
  func.func @_sjlt_fused_kernel(%arg0: i32, %arg1: i32, %arg2: i32, %arg3: memref<8x256xf32, #tpu.memory_space<vmem>>, %arg4: memref<256x4xi32, #tpu.memory_space<vmem>>, %arg5: memref<256x4xf32, #tpu.memory_space<vmem>>, %arg6: memref<8x128xf32, #tpu.memory_space<vmem>>) attributes {dimension_semantics = [#tpu.dimension_semantics<parallel>, #tpu.dimension_semantics<parallel>, #tpu.dimension_semantics<arbitrary>], iteration_bounds = array<i64: 1, 1, 1>, scalar_prefetch = 0 : i64, scratch_operands = 0 : i64, tpu.core_type = #tpu.core_type<tc>, window_params = [{transform_indices = @transform_0, window_bounds = array<i64: 8, 256>}, {transform_indices = @transform_1, window_bounds = array<i64: 256, 4>}, {transform_indices = @transform_2, window_bounds = array<i64: 256, 4>}, {transform_indices = @transform_3, window_bounds = array<i64: 8, 128>}]} {
    %c0_i32 = arith.constant 0 : i32
    %0 = arith.cmpi eq, %arg2, %c0_i32 : i32
    %1 = arith.extui %0 : i1 to i32
    %c0_i32_0 = arith.constant 0 : i32
    %2 = arith.cmpi ne, %1, %c0_i32_0 : i32
    scf.if %2 {
      %cst_16 = arith.constant 0.000000e+00 : f32
      %52 = vector.broadcast %cst_16 : f32 to vector<8x128xf32>
      %c0_17 = arith.constant 0 : index
      %c0_18 = arith.constant 0 : index
      %53 = vector.load %arg6[%c0_17, %c0_18] : memref<8x128xf32, #tpu.memory_space<vmem>>, vector<8x128xf32>
      tpu.vector_store %arg6[%c0_17, %c0_18], %52 {strides = array<i32>} : memref<8x128xf32, #tpu.memory_space<vmem>>, vector<8x128xf32>,
    } else {
    }
    %c0 = arith.constant 0 : index
    %c0_1 = arith.constant 0 : index
    %3 = vector.load %arg4[%c0, %c0_1] : memref<256x4xi32, #tpu.memory_space<vmem>>, vector<256x4xi32>
    %c0_2 = arith.constant 0 : index
    %c0_3 = arith.constant 0 : index
    %4 = vector.load %arg5[%c0_2, %c0_3] : memref<256x4xf32, #tpu.memory_space<vmem>>, vector<256x4xf32>
    %c128_i32 = arith.constant 128 : i32
    %5 = arith.muli %arg1, %c128_i32 : i32
    %6 = vector.broadcast %5 : i32 to vector<256x4xi32>
    %7 = arith.subi %3, %6 : vector<256x4xi32>
    %8 = tpu.iota {dimensions = array<i32: 1>} : vector<256x128xi32>
    %9 = vector.extract_strided_slice %7 {offsets = [0, 0], sizes = [256, 1], strides = [1, 1]} : vector<256x4xi32> to vector<256x1xi32>
    %10 = vector.broadcast %9 : vector<256x1xi32> to vector<256x128xi32>
    %11 = arith.cmpi eq, %8, %10 : vector<256x128xi32>
    %12 = vector.extract_strided_slice %4 {offsets = [0, 0], sizes = [256, 1], strides = [1, 1]} : vector<256x4xf32> to vector<256x1xf32>
    %cst = arith.constant 0.000000e+00 : f32
    %13 = vector.shape_cast %12 : vector<256x1xf32> to vector<256x1xf32>
    %14 = vector.broadcast %13 : vector<256x1xf32> to vector<256x128xf32>
    %15 = vector.broadcast %cst : f32 to vector<256x128xf32>
    %16 = arith.select %11, %14, %15 : vector<256x128xi1>, vector<256x128xf32>
    %17 = vector.extract_strided_slice %7 {offsets = [0, 1], sizes = [256, 1], strides = [1, 1]} : vector<256x4xi32> to vector<256x1xi32>
    %18 = vector.broadcast %17 : vector<256x1xi32> to vector<256x128xi32>
    %19 = arith.cmpi eq, %8, %18 : vector<256x128xi32>
    %20 = vector.extract_strided_slice %4 {offsets = [0, 1], sizes = [256, 1], strides = [1, 1]} : vector<256x4xf32> to vector<256x1xf32>
    %cst_4 = arith.constant 0.000000e+00 : f32
    %21 = vector.shape_cast %20 : vector<256x1xf32> to vector<256x1xf32>
    %22 = vector.broadcast %21 : vector<256x1xf32> to vector<256x128xf32>
    %23 = vector.broadcast %cst_4 : f32 to vector<256x128xf32>
    %24 = arith.select %19, %22, %23 : vector<256x128xi1>, vector<256x128xf32>
    %25 = arith.addf %16, %24 : vector<256x128xf32>
    %26 = vector.extract_strided_slice %7 {offsets = [0, 2], sizes = [256, 1], strides = [1, 1]} : vector<256x4xi32> to vector<256x1xi32>
    %27 = vector.broadcast %26 : vector<256x1xi32> to vector<256x128xi32>
    %28 = arith.cmpi eq, %8, %27 : vector<256x128xi32>
    %29 = vector.extract_strided_slice %4 {offsets = [0, 2], sizes = [256, 1], strides = [1, 1]} : vector<256x4xf32> to vector<256x1xf32>
    %cst_5 = arith.constant 0.000000e+00 : f32
    %30 = vector.shape_cast %29 : vector<256x1xf32> to vector<256x1xf32>
    %31 = vector.broadcast %30 : vector<256x1xf32> to vector<256x128xf32>
    %32 = vector.broadcast %cst_5 : f32 to vector<256x128xf32>
    %33 = arith.select %28, %31, %32 : vector<256x128xi1>, vector<256x128xf32>
    %34 = arith.addf %25, %33 : vector<256x128xf32>
    %35 = vector.extract_strided_slice %7 {offsets = [0, 3], sizes = [256, 1], strides = [1, 1]} : vector<256x4xi32> to vector<256x1xi32>
    %36 = vector.broadcast %35 : vector<256x1xi32> to vector<256x128xi32>
    %37 = arith.cmpi eq, %8, %36 : vector<256x128xi32>
    %38 = vector.extract_strided_slice %4 {offsets = [0, 3], sizes = [256, 1], strides = [1, 1]} : vector<256x4xf32> to vector<256x1xf32>
    %cst_6 = arith.constant 0.000000e+00 : f32
    %39 = vector.shape_cast %38 : vector<256x1xf32> to vector<256x1xf32>
    %40 = vector.broadcast %39 : vector<256x1xf32> to vector<256x128xf32>
    %41 = vector.broadcast %cst_6 : f32 to vector<256x128xf32>
    %42 = arith.select %37, %40, %41 : vector<256x128xi1>, vector<256x128xf32>
    %43 = arith.addf %34, %42 : vector<256x128xf32>
    %c0_7 = arith.constant 0 : index
    %c0_8 = arith.constant 0 : index
    %44 = vector.load %arg6[%c0_7, %c0_8] : memref<8x128xf32, #tpu.memory_space<vmem>>, vector<8x128xf32>
    %c0_9 = arith.constant 0 : index
    %c0_10 = arith.constant 0 : index
    %45 = vector.load %arg3[%c0_9, %c0_10] : memref<8x256xf32, #tpu.memory_space<vmem>>, vector<8x256xf32>
    %cst_11 = arith.constant dense<0.000000e+00> : vector<8x128xf32>
    %46 = tpu.matmul %45, %43, %cst_11 {dimension_numbers = #tpu.dot_dimension_numbers<[1], [0], [0], [1], [0, 0, 1, 1], [], []>} : vector<8x256xf32>, vector<256x128xf32>, vector<8x128xf32> -> vector<8x128xf32>
    %47 = arith.addf %44, %46 : vector<8x128xf32>
    %c0_12 = arith.constant 0 : index
    %c0_13 = arith.constant 0 : index
    %48 = vector.load %arg6[%c0_12, %c0_13] : memref<8x128xf32, #tpu.memory_space<vmem>>, vector<8x128xf32>
    tpu.vector_store %arg6[%c0_12, %c0_13], %47 {strides = array<i32>} : memref<8x128xf32, #tpu.memory_space<vmem>>, vector<8x128xf32>,
    %c0_i32_14 = arith.constant 0 : i32
    %49 = arith.cmpi eq, %arg2, %c0_i32_14 : i32
    %50 = arith.extui %49 : i1 to i32
    %c0_i32_15 = arith.constant 0 : i32
    %51 = arith.cmpi ne, %50, %c0_i32_15 : i32
    scf.if %51 {
      %c0_16 = arith.constant 0 : index
      %c0_17 = arith.constant 0 : index
      %52 = vector.load %arg6[%c0_16, %c0_17] : memref<8x128xf32, #tpu.memory_space<vmem>>, vector<8x128xf32>
      %cst_18 = arith.constant 5.000000e-01 : f32
      %53 = vector.broadcast %cst_18 : f32 to vector<8x128xf32>
      %54 = arith.mulf %52, %53 : vector<8x128xf32>
      %c0_19 = arith.constant 0 : index
      %c0_20 = arith.constant 0 : index
      %55 = vector.load %arg6[%c0_19, %c0_20] : memref<8x128xf32, #tpu.memory_space<vmem>>, vector<8x128xf32>
      tpu.vector_store %arg6[%c0_19, %c0_20], %54 {strides = array<i32>} : memref<8x128xf32, #tpu.memory_space<vmem>>, vector<8x128xf32>,
    } else {
    }
    return
  }
  func.func @transform_0(%arg0: i32, %arg1: i32, %arg2: i32) -> (i32, i32) {
    %c0_i32 = arith.constant 0 : i32
    return %arg0, %arg2 : i32, i32
  }
  func.func @transform_1(%arg0: i32, %arg1: i32, %arg2: i32) -> (i32, i32) {
    %c0_i32 = arith.constant 0 : i32
    %c0_i32_0 = arith.constant 0 : i32
    return %arg2, %c0_i32 : i32, i32
  }
  func.func @transform_2(%arg0: i32, %arg1: i32, %arg2: i32) -> (i32, i32) {
    %c0_i32 = arith.constant 0 : i32
    %c0_i32_0 = arith.constant 0 : i32
    return %arg2, %c0_i32 : i32, i32
  }
  func.func @transform_3(%arg0: i32, %arg1: i32, %arg2: i32) -> (i32, i32) {
    %c0_i32 = arith.constant 0 : i32
    return %arg0, %arg1 : i32, i32
  }
}

</mosaic_0001>

<bundles_post_ra>
// kernel: tpu_custom_call.1
= control target key start
LH: loop header
LB: loop body
LE: loop exit
PB: predicated region body
PF: predicated region fallthrough
CT: control target
= control target key end

     0   :  { %v1622_v2 = vmov 0   ;;  %s3013_s0 = inlined_call_operand.vmem [shape: f32[8,256], index: 0, kind: input, shape index: {}]   ;;  %s3014_s1 = inlined_call_operand.vmem [shape: s32[256,4], index: 1, kind: input, shape index: {}]   ;;  %s3015_s2 = inlined_call_operand.vmem [shape: f32[256,4], index: 2, kind: input, shape index: {}]   ;;  %s3016_s3 = inlined_call_operand.hbm [shape: f32[8,128], index: 3, kind: output, shape index: {}]  }
   0x1   :  { %v1650_v0 = vld [vmem:[%s3014_s1 + $0x10] sm:$0xff]  ;;  %v1655_v1 = vld [vmem:[%s3014_s1] sm:$0xff]  ;;  %1569 = vset.pattern.permute.xlu1 %v1622_v2  ;;  %1568 = vset.pattern.permute.xlu0 %v1622_v2  ;;  %v1662_v3 = vld [vmem:[%s3014_s1 + $0x18] sm:$0xff] }
   0x2   :  { %127 = vperm.xlu1 %1569, %v1650_v0   ;;  %121 = vperm.xlu0 %1568, %v1655_v1   ;;  %v1667_v4 = vld [vmem:[%s3014_s1 + $0x8] sm:$0xff]  ;;  %v1679_v6 = vld [vmem:[%s3014_s1 + $0x20] sm:$0xff]  ;;  %v1686_v7 = vld [vmem:[%s3014_s1 + $0x38] sm:$0xff] }
   0x3   :  { %v1674_v5 = vld [vmem:[%s3014_s1 + $0x28] sm:$0xff]  ;;  %v1691_v8 = vld [vmem:[%s3014_s1 + $0x30] sm:$0xff]  ;;  %v1703_v10 = vld [vmem:[%s3014_s1 + $0x40] sm:$0xff] }
   0x4   :  { %v1698_v9 = vld [vmem:[%s3014_s1 + $0x48] sm:$0xff]  ;;  %v1710_v11 = vld [vmem:[%s3014_s1 + $0x58] sm:$0xff]  ;;  %v1715_v12 = vld [vmem:[%s3014_s1 + $0x50] sm:$0xff] }
   0x6   :  { %130 = vperm.xlu1 %1569, %v1662_v3   ;;  %124 = vperm.xlu0 %1568, %v1667_v4  }
   0xa   :  { %136 = vperm.xlu1 %1569, %v1674_v5   ;;  %133 = vperm.xlu0 %1568, %v1679_v6  }
   0xe   :  { %142 = vperm.xlu1 %1569, %v1686_v7   ;;  %139 = vperm.xlu0 %1568, %v1691_v8  }
  0x12   :  { %148 = vperm.xlu1 %1569, %v1698_v9   ;;  %145 = vperm.xlu0 %1568, %v1703_v10  }
  0x13   :  { %8 = vsyncpa [#allocation3], 0  ;;  %v1722_v13 = vld [vmem:[%s3014_s1 + $0x68] sm:$0xff]  ;;  %v1727_v14 = vld [vmem:[%s3014_s1 + $0x60] sm:$0xff]  ;;  %s1626_s23 = smov [#allocation2]  }
  0x14   :  { %v1734_v15 = vld [vmem:[%s3014_s1 + $0x78] sm:$0xff]  ;;  %v1739_v16 = vld [vmem:[%s3014_s1 + $0x70] sm:$0xff]  ;;  %v1746_v17 = vld [vmem:[%s3014_s1 + $0x88] sm:$0xff]  ;;  %s1487_s24 = sshll.u32 %s1626_s23, 4  ;;  %s1488_s24 = int_to_ptr.vmem [resolvable:$true] %s1487_s24 }
  0x15   :  { %v1751_v18 = vld [vmem:[%s3014_s1 + $0x80] sm:$0xff]  ;;  %v1758_v19 = vld [vmem:[%s3014_s1 + $0x98] sm:$0xff]  ;;  %v1763_v20 = vld [vmem:[%s3014_s1 + $0x90] sm:$0xff]  ;;  %s1598_s25 = scalar_lea.vmem %s1488_s24, 128  ;;  %p1603_p1 = scmp.lt.s32.totalorder %s1488_s24, %s1488_s24 }
  0x16   :  { %154 = vperm.xlu1 %1569, %v1710_v11   ;;  %151 = vperm.xlu0 %1568, %v1715_v12   ;;  %v1770_v21 = vld [vmem:[%s3014_s1 + $0xa8] sm:$0xff]  ;;  %v1775_v22 = vld [vmem:[%s3014_s1 + $0xa0] sm:$0xff]  ;;  %v1782_v23 = vld [vmem:[%s3014_s1 + $0xb8] sm:$0xff]  ;;  %p1599_p0 = scmp.ne.s32.totalorder %s1488_s24, %s1598_s25  ;;  %p1604_p2 = scmp.lt.s32.totalorder %s1598_s25, %s1598_s25 }
  0x17   :  { %v1787_v24 = vld [vmem:[%s3014_s1 + $0xb0] sm:$0xff]  ;;  %v1794_v25 = vld [vmem:[%s3014_s1 + $0xc8] sm:$0xff]  ;;  %v1799_v26 = vld [vmem:[%s3014_s1 + $0xc0] sm:$0xff] }
  0x18   :  { %v1806_v27 = vld [vmem:[%s3014_s1 + $0xd8] sm:$0xff]  ;;  %v1811_v28 = vld [vmem:[%s3014_s1 + $0xd0] sm:$0xff]  ;;  %v1818_v29 = vld [vmem:[%s3014_s1 + $0xe8] sm:$0xff]  ;;  %p1605_p3 = por %p1604_p2, %p1603_p1 }
  0x19   :  { %v1823_v30 = vld [vmem:[%s3014_s1 + $0xe0] sm:$0xff]  ;;  %v1830_v31 = vld [vmem:[%s3014_s1 + $0xf8] sm:$0xff]  ;;  %v1835_v32 = vld [vmem:[%s3014_s1 + $0xf0] sm:$0xff] }
  0x1a   :  { %160 = vperm.xlu1 %1569, %v1722_v13   ;;  %157 = vperm.xlu0 %1568, %v1727_v14   ;;  %v1842_v33 = vld [vmem:[%s3015_s2 + $0x8] sm:$0xff]  ;;  %v1847_v34 = vld [vmem:[%s3015_s2] sm:$0xff]  ;;  %v1854_v35 = vld [vmem:[%s3015_s2 + $0x18] sm:$0xff]  ;;  %p1606_p4 = pnand %p1605_p3, %p1599_p0 }
  0x1b   :  { %v1859_v36 = vld [vmem:[%s3015_s2 + $0x10] sm:$0xff]  ;;  %v1866_v37 = vld [vmem:[%s3015_s2 + $0x28] sm:$0xff]  ;;  %v1871_v38 = vld [vmem:[%s3015_s2 + $0x20] sm:$0xff] }
  0x1c   :  { %v1878_v39 = vld [vmem:[%s3015_s2 + $0x38] sm:$0xff]  ;;  %v1883_v40 = vld [vmem:[%s3015_s2 + $0x30] sm:$0xff]  ;;  %v1890_v41 = vld [vmem:[%s3015_s2 + $0x48] sm:$0xff] }
  0x1d   :  { %v1895_v42 = vld [vmem:[%s3015_s2 + $0x40] sm:$0xff]  ;;  %v1902_v43 = vld [vmem:[%s3015_s2 + $0x58] sm:$0xff]  ;;  %v1907_v44 = vld [vmem:[%s3015_s2 + $0x50] sm:$0xff] }
  0x1e   :  { %166 = vperm.xlu1 %1569, %v1734_v15   ;;  %163 = vperm.xlu0 %1568, %v1739_v16   ;;  %v1914_v45 = vld [vmem:[%s3015_s2 + $0x68] sm:$0xff]  ;;  %v1919_v46 = vld [vmem:[%s3015_s2 + $0x60] sm:$0xff]  ;;  %v1926_v47 = vld [vmem:[%s3015_s2 + $0x78] sm:$0xff] }
  0x1f   :  { %3054 = vst [vmem:[#allocation5_spill] sm:$0xff] %v1914_v45  ;;  %3055 = vst [vmem:[#allocation6_spill] sm:$0xff] %v1926_v47  ;;  %v1931_v48 = vld [vmem:[%s3015_s2 + $0x70] sm:$0xff]  ;;  %v1938_v49 = vld [vmem:[%s3015_s2 + $0x88] sm:$0xff] }
  0x20   :  { %v1943_v50 = vld [vmem:[%s3015_s2 + $0x80] sm:$0xff]  ;;  %v1950_v51 = vld [vmem:[%s3015_s2 + $0x98] sm:$0xff]  ;;  %v1955_v52 = vld [vmem:[%s3015_s2 + $0x90] sm:$0xff] }
  0x21   :  { %v1962_v53 = vld [vmem:[%s3015_s2 + $0xa8] sm:$0xff]  ;;  %v1967_v54 = vld [vmem:[%s3015_s2 + $0xa0] sm:$0xff]  ;;  %v1974_v55 = vld [vmem:[%s3015_s2 + $0xb8] sm:$0xff] }
  0x22   :  { %172 = vperm.xlu1 %1569, %v1746_v17   ;;  %169 = vperm.xlu0 %1568, %v1751_v18   ;;  %3056 = vst [vmem:[#allocation7_spill] sm:$0xff] %v1962_v53  ;;  %3057 = vst [vmem:[#allocation8_spill] sm:$0xff] %v1974_v55  ;;  %v1979_v56 = vld [vmem:[%s3015_s2 + $0xb0] sm:$0xff]  ;;  %v1986_v57 = vld [vmem:[%s3015_s2 + $0xc8] sm:$0xff] }
  0x23   :  { %3058 = vst [vmem:[#allocation9_spill] sm:$0xff] %v1986_v57  ;;  %v1991_v58 = vld [vmem:[%s3015_s2 + $0xc0] sm:$0xff]  ;;  %v1998_v59 = vld [vmem:[%s3015_s2 + $0xd8] sm:$0xff]  ;;  %v2003_v60 = vld [vmem:[%s3015_s2 + $0xd0] sm:$0xff] }
  0x24   :  { %3059 = vst [vmem:[#allocation10_spill] sm:$0xff] %v1998_v59  ;;  %3060 = vst [vmem:[#allocation11_spill] sm:$0xff] %v2003_v60  ;;  %v2010_v61 = vld [vmem:[%s3015_s2 + $0xe8] sm:$0xff]  ;;  %v2015_v62 = vld [vmem:[%s3015_s2 + $0xe0] sm:$0xff] }
  0x25   :  { %3061 = vst [vmem:[#allocation12_spill] sm:$0xff] %v2010_v61  ;;  %3062 = vst [vmem:[#allocation13_spill] sm:$0xff] %v2015_v62  ;;  %v2022_v63 = vld [vmem:[%s3015_s2 + $0xf8] sm:$0xff]  ;;  %v2027_v2 = vld [vmem:[%s3015_s2 + $0xf0] sm:$0xff] }
  0x26   :  { %178 = vperm.xlu1 %1569, %v1758_v19   ;;  %175 = vperm.xlu0 %1568, %v1763_v20   ;;  %3063 = vst [vmem:[#allocation14_spill] sm:$0xff] %v2022_v63 }
  0x2a   :  { %184 = vperm.xlu1 %1569, %v1770_v21   ;;  %181 = vperm.xlu0 %1568, %v1775_v22  }
  0x2e   :  { %190 = vperm.xlu1 %1569, %v1782_v23   ;;  %187 = vperm.xlu0 %1568, %v1787_v24  }
  0x32   :  { %196 = vperm.xlu1 %1569, %v1794_v25   ;;  %193 = vperm.xlu0 %1568, %v1799_v26  }
  0x36   :  { %202 = vperm.xlu1 %1569, %v1806_v27   ;;  %199 = vperm.xlu0 %1568, %v1811_v28  }
  0x3a   :  { %208 = vperm.xlu1 %1569, %v1818_v29   ;;  %205 = vperm.xlu0 %1568, %v1823_v30  }
  0x3e   :  { %214 = vperm.xlu1 %1569, %v1830_v31   ;;  %211 = vperm.xlu0 %1568, %v1835_v32  }
  0x42   :  { %255 = vperm.xlu1 %1569, %v1842_v33   ;;  %250 = vperm.xlu0 %1568, %v1847_v34  }
  0x46   :  { %265 = vperm.xlu1 %1569, %v1854_v35   ;;  %260 = vperm.xlu0 %1568, %v1859_v36  }
  0x4a   :  { %275 = vperm.xlu1 %1569, %v1866_v37   ;;  %270 = vperm.xlu0 %1568, %v1871_v38  }
  0x4e   :  { %285 = vperm.xlu1 %1569, %v1878_v39   ;;  %280 = vperm.xlu0 %1568, %v1883_v40  }
  0x52   :  { %295 = vperm.xlu1 %1569, %v1890_v41   ;;  %290 = vperm.xlu0 %1568, %v1895_v42  }
  0x56   :  { %305 = vperm.xlu1 %1569, %v1902_v43   ;;  %300 = vperm.xlu0 %1568, %v1907_v44  }
  0x5a   :  { %315 = vperm.xlu1 %1569, %v1914_v45   ;;  %310 = vperm.xlu0 %1568, %v1919_v46  }
  0x5e   :  { %325 = vperm.xlu1 %1569, %v1926_v47   ;;  %320 = vperm.xlu0 %1568, %v1931_v48  }
  0x62   :  { %335 = vperm.xlu1 %1569, %v1938_v49   ;;  %330 = vperm.xlu0 %1568, %v1943_v50  }
  0x66   :  { %345 = vperm.xlu1 %1569, %v1950_v51   ;;  %340 = vperm.xlu0 %1568, %v1955_v52  }
  0x6a   :  { %355 = vperm.xlu1 %1569, %v1962_v53   ;;  %350 = vperm.xlu0 %1568, %v1967_v54  }
  0x6e   :  { %365 = vperm.xlu1 %1569, %v1974_v55   ;;  %360 = vperm.xlu0 %1568, %v1979_v56  }
  0x72   :  { %375 = vperm.xlu1 %1569, %v1986_v57   ;;  %370 = vperm.xlu0 %1568, %v1991_v58  }
  0x76   :  { %385 = vperm.xlu1 %1569, %v1998_v59   ;;  %380 = vperm.xlu0 %1568, %v2003_v60  }
  0x7a   :  { %395 = vperm.xlu1 %1569, %v2010_v61   ;;  %390 = vperm.xlu0 %1568, %v2015_v62   ;;  %v1623_v61 = vmov 1  }
  0x7e   :  { %405 = vperm.xlu1 %1569, %v2022_v63   ;;  %400 = vperm.xlu0 %1568, %v2027_v2  }
  0x81   :  { %v2031_v59 = vpop.permute.xlu1 %127  ;;  %v2033_v60 = vpop.permute.xlu0 %121 }
  0x82   :  { %3064 = vst [vmem:[#allocation15_spill] sm:$0xff] %v2031_v59  ;;  %3065 = vst [vmem:[#allocation16_spill] sm:$0xff] %v2033_v60  ;;  %1571 = vset.pattern.permute.xlu1 %v1623_v61  ;;  %1570 = vset.pattern.permute.xlu0 %v1623_v61 }
  0x83   :  { %444 = vperm.xlu1 %1571, %v1667_v4   ;;  %441 = vperm.xlu0 %1570, %v1655_v1  }
  0x85   :  { %v2037_v62 = vpop.permute.xlu1 %130  ;;  %v2039_v57 = vpop.permute.xlu0 %124 }
  0x86   :  { %3066 = vst [vmem:[#allocation17_spill] sm:$0xff] %v2037_v62  ;;  %3067 = vst [vmem:[#allocation18_spill] sm:$0xff] %v2039_v57 }
  0x87   :  { %447 = vperm.xlu1 %1571, %v1650_v0   ;;  %450 = vperm.xlu0 %1570, %v1662_v3  }
  0x89   :  { %v2043_v63 = vpop.permute.xlu1 %136  ;;  %v2045_v59 = vpop.permute.xlu0 %133 }
  0x8a   :  { %3068 = vst [vmem:[#allocation19_spill] sm:$0xff] %v2043_v63  ;;  %3069 = vst [vmem:[#allocation20_spill] sm:$0xff] %v2045_v59 }
  0x8b   :  { %453 = vperm.xlu1 %1571, %v1679_v6   ;;  %456 = vperm.xlu0 %1570, %v1674_v5  }
  0x8d   :  { %v2049_v61 = vpop.permute.xlu1 %142  ;;  %v2051_v60 = vpop.permute.xlu0 %139 }
  0x8e   :  { %3070 = vst [vmem:[#allocation21_spill] sm:$0xff] %v2049_v61  ;;  %3071 = vst [vmem:[#allocation22_spill] sm:$0xff] %v2051_v60 }
  0x8f   :  { %459 = vperm.xlu1 %1571, %v1691_v8   ;;  %462 = vperm.xlu0 %1570, %v1686_v7  }
  0x91   :  { %v2055_v62 = vpop.permute.xlu1 %148  ;;  %v2057_v57 = vpop.permute.xlu0 %145 }
  0x92   :  { %3072 = vst [vmem:[#allocation23_spill] sm:$0xff] %v2055_v62  ;;  %3073 = vst [vmem:[#allocation24_spill] sm:$0xff] %v2057_v57 }
  0x93   :  { %465 = vperm.xlu1 %1571, %v1703_v10   ;;  %468 = vperm.xlu0 %1570, %v1698_v9  }
  0x95   :  { %v2061_v59 = vpop.permute.xlu1 %154  ;;  %v2063_v63 = vpop.permute.xlu0 %151 }
  0x96   :  { %3074 = vst [vmem:[#allocation25_spill] sm:$0xff] %v2061_v59  ;;  %3075 = vst [vmem:[#allocation26_spill] sm:$0xff] %v2063_v63 }
  0x97   :  { %471 = vperm.xlu1 %1571, %v1715_v12   ;;  %474 = vperm.xlu0 %1570, %v1710_v11  }
  0x99   :  { %v2067_v60 = vpop.permute.xlu1 %160  ;;  %v2069_v61 = vpop.permute.xlu0 %157 }
  0x9a   :  { %3076 = vst [vmem:[#allocation27_spill] sm:$0xff] %v2067_v60  ;;  %3077 = vst [vmem:[#allocation28_spill] sm:$0xff] %v2069_v61 }
  0x9b   :  { %477 = vperm.xlu1 %1571, %v1727_v14   ;;  %480 = vperm.xlu0 %1570, %v1722_v13  }
  0x9d   :  { %v2073_v57 = vpop.permute.xlu1 %166  ;;  %v2075_v62 = vpop.permute.xlu0 %163 }
  0x9e   :  { %3078 = vst [vmem:[#allocation29_spill] sm:$0xff] %v2073_v57  ;;  %3079 = vst [vmem:[#allocation30_spill] sm:$0xff] %v2075_v62 }
  0x9f   :  { %483 = vperm.xlu1 %1571, %v1739_v16   ;;  %486 = vperm.xlu0 %1570, %v1734_v15  }
  0xa1   :  { %v2079_v63 = vpop.permute.xlu1 %172  ;;  %v2081_v59 = vpop.permute.xlu0 %169 }
  0xa2   :  { %3080 = vst [vmem:[#allocation31_spill] sm:$0xff] %v2079_v63  ;;  %3081 = vst [vmem:[#allocation32_spill] sm:$0xff] %v2081_v59 }
  0xa3   :  { %489 = vperm.xlu1 %1571, %v1751_v18   ;;  %492 = vperm.xlu0 %1570, %v1746_v17  }
  0xa5   :  { %v2085_v61 = vpop.permute.xlu1 %178  ;;  %v2087_v60 = vpop.permute.xlu0 %175 }
  0xa6   :  { %3082 = vst [vmem:[#allocation33_spill] sm:$0xff] %v2085_v61  ;;  %3083 = vst [vmem:[#allocation34_spill] sm:$0xff] %v2087_v60 }
  0xa7   :  { %495 = vperm.xlu1 %1571, %v1763_v20   ;;  %498 = vperm.xlu0 %1570, %v1758_v19  }
  0xa9   :  { %v2091_v62 = vpop.permute.xlu1 %184  ;;  %v2093_v57 = vpop.permute.xlu0 %181 }
  0xaa   :  { %3084 = vst [vmem:[#allocation35_spill] sm:$0xff] %v2091_v62  ;;  %3085 = vst [vmem:[#allocation36_spill] sm:$0xff] %v2093_v57 }
  0xab   :  { %501 = vperm.xlu1 %1571, %v1775_v22   ;;  %504 = vperm.xlu0 %1570, %v1770_v21  }
  0xad   :  { %v2097_v59 = vpop.permute.xlu1 %190  ;;  %v2099_v63 = vpop.permute.xlu0 %187 }
  0xae   :  { %3086 = vst [vmem:[#allocation37_spill] sm:$0xff] %v2097_v59  ;;  %3087 = vst [vmem:[#allocation38_spill] sm:$0xff] %v2099_v63 }
  0xaf   :  { %507 = vperm.xlu1 %1571, %v1787_v24   ;;  %510 = vperm.xlu0 %1570, %v1782_v23  }
  0xb1   :  { %v2103_v60 = vpop.permute.xlu1 %196  ;;  %v2105_v61 = vpop.permute.xlu0 %193 }
  0xb2   :  { %3088 = vst [vmem:[#allocation39_spill] sm:$0xff] %v2103_v60  ;;  %3089 = vst [vmem:[#allocation40_spill] sm:$0xff] %v2105_v61 }
  0xb3   :  { %513 = vperm.xlu1 %1571, %v1799_v26   ;;  %516 = vperm.xlu0 %1570, %v1794_v25  }
  0xb5   :  { %v2109_v57 = vpop.permute.xlu1 %202  ;;  %v2111_v62 = vpop.permute.xlu0 %199 }
  0xb6   :  { %3090 = vst [vmem:[#allocation41_spill] sm:$0xff] %v2109_v57  ;;  %3091 = vst [vmem:[#allocation42_spill] sm:$0xff] %v2111_v62 }
  0xb7   :  { %519 = vperm.xlu1 %1571, %v1811_v28   ;;  %522 = vperm.xlu0 %1570, %v1806_v27  }
  0xb9   :  { %v2115_v63 = vpop.permute.xlu1 %208  ;;  %v2117_v59 = vpop.permute.xlu0 %205 }
  0xba   :  { %3092 = vst [vmem:[#allocation43_spill] sm:$0xff] %v2115_v63  ;;  %3093 = vst [vmem:[#allocation44_spill] sm:$0xff] %v2117_v59 }
  0xbb   :  { %525 = vperm.xlu1 %1571, %v1823_v30   ;;  %528 = vperm.xlu0 %1570, %v1818_v29  }
  0xbd   :  { %v2121_v61 = vpop.permute.xlu1 %214  ;;  %v2123_v60 = vpop.permute.xlu0 %211 }
  0xbe   :  { %3094 = vst [vmem:[#allocation45_spill] sm:$0xff] %v2121_v61  ;;  %3095 = vst [vmem:[#allocation46_spill] sm:$0xff] %v2123_v60 }
  0xbf   :  { %531 = vperm.xlu1 %1571, %v1835_v32   ;;  %534 = vperm.xlu0 %1570, %v1830_v31  }
  0xc1   :  { %v2127_v62 = vpop.permute.xlu1 %255  ;;  %v2129_v57 = vpop.permute.xlu0 %250 }
  0xc2   :  { %3096 = vst [vmem:[#allocation47_spill] sm:$0xff] %v2127_v62  ;;  %3097 = vst [vmem:[#allocation48_spill] sm:$0xff] %v2129_v57 }
  0xc3   :  { %569 = vperm.xlu1 %1571, %v1847_v34   ;;  %573 = vperm.xlu0 %1570, %v1842_v33  }
  0xc5   :  { %v2133_v59 = vpop.permute.xlu1 %265  ;;  %v2135_v63 = vpop.permute.xlu0 %260 }
  0xc6   :  { %3098 = vst [vmem:[#allocation49_spill] sm:$0xff] %v2133_v59  ;;  %3099 = vst [vmem:[#allocation50_spill] sm:$0xff] %v2135_v63 }
  0xc7   :  { %577 = vperm.xlu1 %1571, %v1859_v36   ;;  %581 = vperm.xlu0 %1570, %v1854_v35  }
  0xc9   :  { %v2139_v60 = vpop.permute.xlu1 %275  ;;  %v2141_v61 = vpop.permute.xlu0 %270 }
  0xca   :  { %3100 = vst [vmem:[#allocation51_spill] sm:$0xff] %v2139_v60  ;;  %3101 = vst [vmem:[#allocation52_spill] sm:$0xff] %v2141_v61 }
  0xcb   :  { %585 = vperm.xlu1 %1571, %v1871_v38   ;;  %589 = vperm.xlu0 %1570, %v1866_v37  }
  0xcd   :  { %v2145_v57 = vpop.permute.xlu1 %285  ;;  %v2147_v62 = vpop.permute.xlu0 %280 }
  0xce   :  { %3102 = vst [vmem:[#allocation53_spill] sm:$0xff] %v2145_v57  ;;  %3103 = vst [vmem:[#allocation54_spill] sm:$0xff] %v2147_v62 }
  0xcf   :  { %593 = vperm.xlu1 %1571, %v1883_v40   ;;  %597 = vperm.xlu0 %1570, %v1878_v39  }
  0xd1   :  { %v2151_v63 = vpop.permute.xlu1 %295  ;;  %v2153_v59 = vpop.permute.xlu0 %290 }
  0xd2   :  { %3104 = vst [vmem:[#allocation55_spill] sm:$0xff] %v2151_v63  ;;  %3105 = vst [vmem:[#allocation56_spill] sm:$0xff] %v2153_v59 }
  0xd3   :  { %601 = vperm.xlu1 %1571, %v1895_v42   ;;  %605 = vperm.xlu0 %1570, %v1890_v41  }
  0xd5   :  { %v2157_v61 = vpop.permute.xlu1 %305  ;;  %v2159_v60 = vpop.permute.xlu0 %300 }
  0xd6   :  { %3106 = vst [vmem:[#allocation57_spill] sm:$0xff] %v2157_v61  ;;  %3107 = vst [vmem:[#allocation58_spill] sm:$0xff] %v2159_v60 }
  0xd7   :  { %609 = vperm.xlu1 %1571, %v1907_v44   ;;  %613 = vperm.xlu0 %1570, %v1902_v43  }
  0xd9   :  { %v2163_v62 = vpop.permute.xlu1 %315  ;;  %v2165_v57 = vpop.permute.xlu0 %310 }
  0xda   :  { %3108 = vst [vmem:[#allocation59_spill] sm:$0xff] %v2163_v62  ;;  %3109 = vst [vmem:[#allocation60_spill] sm:$0xff] %v2165_v57 }
  0xdb   :  { %617 = vperm.xlu1 %1571, %v1919_v46   ;;  %621 = vperm.xlu0 %1570, %v1914_v45  }
  0xdd   :  { %v2169_v59 = vpop.permute.xlu1 %325  ;;  %v2171_v63 = vpop.permute.xlu0 %320 }
  0xde   :  { %3110 = vst [vmem:[#allocation61_spill] sm:$0xff] %v2169_v59  ;;  %3111 = vst [vmem:[#allocation62_spill] sm:$0xff] %v2171_v63 }
  0xdf   :  { %625 = vperm.xlu1 %1571, %v1931_v48   ;;  %629 = vperm.xlu0 %1570, %v1926_v47   ;;  %v3125_v47 = vld [vmem:[#allocation11_spill] sm:$0xff] }
  0xe1   :  { %v2175_v60 = vpop.permute.xlu1 %335  ;;  %v2177_v61 = vpop.permute.xlu0 %330 }
  0xe2   :  { %3112 = vst [vmem:[#allocation63_spill] sm:$0xff] %v2175_v60  ;;  %3113 = vst [vmem:[#allocation64_spill] sm:$0xff] %v2177_v61 }
  0xe3   :  { %633 = vperm.xlu1 %1571, %v1943_v50   ;;  %637 = vperm.xlu0 %1570, %v1938_v49  }
  0xe5   :  { %v2181_v57 = vpop.permute.xlu1 %345  ;;  %v2183_v62 = vpop.permute.xlu0 %340 }
  0xe6   :  { %3114 = vst [vmem:[#allocation65_spill] sm:$0xff] %v2181_v57  ;;  %3115 = vst [vmem:[#allocation66_spill] sm:$0xff] %v2183_v62 }
  0xe7   :  { %641 = vperm.xlu1 %1571, %v1955_v52   ;;  %645 = vperm.xlu0 %1570, %v1950_v51  }
  0xe9   :  { %v2187_v63 = vpop.permute.xlu1 %355  ;;  %v2189_v48 = vpop.permute.xlu0 %350 }
  0xea   :  { %3116 = vst [vmem:[#allocation67_spill] sm:$0xff] %v2187_v63  ;;  %3117 = vst [vmem:[#allocation68_spill] sm:$0xff] %v2189_v48  ;;  %v3122_v63 = vld [vmem:[#allocation9_spill] sm:$0xff] }
  0xeb   :  { %649 = vperm.xlu1 %1571, %v1967_v54   ;;  %653 = vperm.xlu0 %1570, %v1962_v53  }
  0xed   :  { %v2193_v59 = vpop.permute.xlu1 %365  ;;  %v2195_v61 = vpop.permute.xlu0 %360 }
  0xee   :  { %3118 = vst [vmem:[#allocation69_spill] sm:$0xff] %v2193_v59  ;;  %3119 = vst [vmem:[#allocation70_spill] sm:$0xff] %v2195_v61  ;;  %v3126_v59 = vld [vmem:[#allocation10_spill] sm:$0xff] }
  0xef   :  { %657 = vperm.xlu1 %1571, %v1979_v56   ;;  %661 = vperm.xlu0 %1570, %v1974_v55   ;;  %v3129_v55 = vld [vmem:[#allocation13_spill] sm:$0xff] }
  0xf1   :  { %v2199_v62 = vpop.permute.xlu1 %375  ;;  %v2201_v57 = vpop.permute.xlu0 %370 }
  0xf2   :  { %3120 = vst [vmem:[#allocation71_spill] sm:$0xff] %v2199_v62  ;;  %3121 = vst [vmem:[#allocation72_spill] sm:$0xff] %v2201_v57  ;;  %v3130_v62 = vld [vmem:[#allocation12_spill] sm:$0xff] }
  0xf3   :  { %665 = vperm.xlu1 %1571, %v1991_v58   ;;  %669 = vperm.xlu0 %1570, %v3122_v63  }
  0xf5   :  { %v2205_v48 = vpop.permute.xlu1 %385  ;;  %v2207_v60 = vpop.permute.xlu0 %380 }
  0xf6   :  { %3123 = vst [vmem:[#allocation73_spill] sm:$0xff] %v2205_v48  ;;  %3124 = vst [vmem:[#allocation74_spill] sm:$0xff] %v2207_v60  ;;  %v3133_v48 = vld [vmem:[#allocation14_spill] sm:$0xff] }
  0xf7   :  { %673 = vperm.xlu1 %1571, %v3125_v47   ;;  %677 = vperm.xlu0 %1570, %v3126_v59   ;;  %v3048_v59 = vmov 2  }
  0xf9   :  { %v2211_v61 = vpop.permute.xlu1 %395  ;;  %v2213_v45 = vpop.permute.xlu0 %390 }
  0xfa   :  { %3127 = vst [vmem:[#allocation11_spill] sm:$0xff] %v2211_v61  ;;  %3128 = vst [vmem:[#allocation75_spill] sm:$0xff] %v2213_v45 }
  0xfb   :  { %681 = vperm.xlu1 %1571, %v3129_v55   ;;  %685 = vperm.xlu0 %1570, %v3130_v62  }
  0xfd   :  { %v2217_v57 = vpop.permute.xlu1 %405  ;;  %v2219_v53 = vpop.permute.xlu0 %400 }
  0xfe   :  { %3131 = vst [vmem:[#allocation13_spill] sm:$0xff] %v2217_v57  ;;  %3132 = vst [vmem:[#allocation12_spill] sm:$0xff] %v2219_v53 }
  0xff   :  { %689 = vperm.xlu1 %1571, %v2027_v2   ;;  %693 = vperm.xlu0 %1570, %v3133_v48  }
 0x102   :  { %v2223_v60 = vpop.permute.xlu1 %444  ;;  %v2225_v63 = vpop.permute.xlu0 %441 }
 0x103   :  { %1572 = vset.pattern.permute.xlu1 %v3048_v59  ;;  %1573 = vset.pattern.permute.xlu0 %v3048_v59 }
 0x104   :  { %761 = vperm.xlu1 %1572, %v1655_v1   ;;  %764 = vperm.xlu0 %1573, %v1667_v4  }
 0x106   :  { %v2231_v57 = vpop.permute.xlu1 %447  ;;  %v2233_v53 = vpop.permute.xlu0 %450 }
 0x107   :  { %3134 = vst [vmem:[#allocation14_spill] sm:$0xff] %v2231_v57  ;;  %3135 = vst [vmem:[#allocation76_spill] sm:$0xff] %v2233_v53 }
 0x108   :  { %767 = vperm.xlu1 %1572, %v1650_v0   ;;  %773 = vperm.xlu0 %1573, %v1679_v6  }
 0x10a   :  { %v2237_v2 = vpop.permute.xlu1 %453  ;;  %v2239_v45 = vpop.permute.xlu0 %456 }
 0x10b   :  { %3136 = vst [vmem:[#allocation77_spill] sm:$0xff] %v2237_v2  ;;  %3137 = vst [vmem:[#allocation78_spill] sm:$0xff] %v2239_v45 }
 0x10c   :  { %770 = vperm.xlu1 %1572, %v1662_v3   ;;  %779 = vperm.xlu0 %1573, %v1691_v8  }
 0x10e   :  { %v2243_v59 = vpop.permute.xlu1 %459  ;;  %v2245_v61 = vpop.permute.xlu0 %462 }
 0x10f   :  { %3138 = vst [vmem:[#allocation79_spill] sm:$0xff] %v2243_v59  ;;  %3139 = vst [vmem:[#allocation80_spill] sm:$0xff] %v2245_v61 }
 0x110   :  { %776 = vperm.xlu1 %1572, %v1674_v5   ;;  %785 = vperm.xlu0 %1573, %v1703_v10  }
 0x112   :  { %v2249_v57 = vpop.permute.xlu1 %465  ;;  %v2251_v53 = vpop.permute.xlu0 %468 }
 0x113   :  { %3140 = vst [vmem:[#allocation81_spill] sm:$0xff] %v2249_v57  ;;  %3141 = vst [vmem:[#allocation82_spill] sm:$0xff] %v2251_v53 }
 0x114   :  { %782 = vperm.xlu1 %1572, %v1686_v7   ;;  %791 = vperm.xlu0 %1573, %v1715_v12  }
 0x116   :  { %v2255_v2 = vpop.permute.xlu1 %471  ;;  %v2257_v45 = vpop.permute.xlu0 %474 }
 0x117   :  { %3142 = vst [vmem:[#allocation83_spill] sm:$0xff] %v2255_v2  ;;  %3143 = vst [vmem:[#allocation84_spill] sm:$0xff] %v2257_v45 }
 0x118   :  { %788 = vperm.xlu1 %1572, %v1698_v9   ;;  %797 = vperm.xlu0 %1573, %v1727_v14  }
 0x11a   :  { %v2261_v59 = vpop.permute.xlu1 %477  ;;  %v2263_v61 = vpop.permute.xlu0 %480 }
 0x11b   :  { %3144 = vst [vmem:[#allocation85_spill] sm:$0xff] %v2261_v59  ;;  %3145 = vst [vmem:[#allocation86_spill] sm:$0xff] %v2263_v61 }
 0x11c   :  { %794 = vperm.xlu1 %1572, %v1710_v11   ;;  %803 = vperm.xlu0 %1573, %v1739_v16  }
 0x11e   :  { %v2267_v57 = vpop.permute.xlu1 %483  ;;  %v2269_v53 = vpop.permute.xlu0 %486 }
 0x11f   :  { %3146 = vst [vmem:[#allocation87_spill] sm:$0xff] %v2267_v57  ;;  %3147 = vst [vmem:[#allocation88_spill] sm:$0xff] %v2269_v53 }
 0x120   :  { %800 = vperm.xlu1 %1572, %v1722_v13   ;;  %809 = vperm.xlu0 %1573, %v1751_v18  }
 0x122   :  { %v2273_v45 = vpop.permute.xlu1 %489  ;;  %v2275_v2 = vpop.permute.xlu0 %492 }
 0x124   :  { %806 = vperm.xlu1 %1572, %v1734_v15   ;;  %815 = vperm.xlu0 %1573, %v1763_v20  }
 0x126   :  { %v2279_v14 = vpop.permute.xlu1 %495  ;;  %v2281_v59 = vpop.permute.xlu0 %498 }
 0x127   :  { %3148 = vst [vmem:[#allocation89_spill] sm:$0xff] %v2279_v14  ;;  %3149 = vst [vmem:[#allocation90_spill] sm:$0xff] %v2281_v59 }
 0x128   :  { %812 = vperm.xlu1 %1572, %v1746_v17   ;;  %821 = vperm.xlu0 %1573, %v1775_v22  }
 0x12a   :  { %v2285_v16 = vpop.permute.xlu1 %501  ;;  %v2287_v57 = vpop.permute.xlu0 %504 }
 0x12b   :  { %3150 = vst [vmem:[#allocation91_spill] sm:$0xff] %v2285_v16  ;;  %3151 = vst [vmem:[#allocation92_spill] sm:$0xff] %v2287_v57 }
 0x12c   :  { %818 = vperm.xlu1 %1572, %v1758_v19   ;;  %827 = vperm.xlu0 %1573, %v1787_v24  }
 0x12e   :  { %v2291_v53 = vpop.permute.xlu1 %507  ;;  %v2293_v61 = vpop.permute.xlu0 %510 }
 0x12f   :  { %3152 = vst [vmem:[#allocation93_spill] sm:$0xff] %v2291_v53  ;;  %3153 = vst [vmem:[#allocation94_spill] sm:$0xff] %v2293_v61 }
 0x130   :  { %824 = vperm.xlu1 %1572, %v1770_v21   ;;  %833 = vperm.xlu0 %1573, %v1799_v26  }
 0x132   :  { %v2297_v59 = vpop.permute.xlu1 %513  ;;  %v2299_v14 = vpop.permute.xlu0 %516 }
 0x133   :  { %3154 = vst [vmem:[#allocation95_spill] sm:$0xff] %v2297_v59  ;;  %3155 = vst [vmem:[#allocation96_spill] sm:$0xff] %v2299_v14 }
 0x134   :  { %830 = vperm.xlu1 %1572, %v1782_v23   ;;  %839 = vperm.xlu0 %1573, %v1811_v28  }
 0x136   :  { %v2303_v57 = vpop.permute.xlu1 %519  ;;  %v2305_v16 = vpop.permute.xlu0 %522 }
 0x137   :  { %3156 = vst [vmem:[#allocation97_spill] sm:$0xff] %v2303_v57  ;;  %3157 = vst [vmem:[#allocation98_spill] sm:$0xff] %v2305_v16 }
 0x138   :  { %836 = vperm.xlu1 %1572, %v1794_v25   ;;  %845 = vperm.xlu0 %1573, %v1823_v30  }
 0x13a   :  { %v2309_v61 = vpop.permute.xlu1 %525  ;;  %v2311_v53 = vpop.permute.xlu0 %528 }
 0x13b   :  { %3158 = vst [vmem:[#allocation99_spill] sm:$0xff] %v2309_v61  ;;  %3159 = vst [vmem:[#allocation100_spill] sm:$0xff] %v2311_v53 }
 0x13c   :  { %842 = vperm.xlu1 %1572, %v1806_v27   ;;  %851 = vperm.xlu0 %1573, %v1835_v32  }
 0x13e   :  { %v2315_v14 = vpop.permute.xlu1 %531  ;;  %v2317_v59 = vpop.permute.xlu0 %534 }
 0x13f   :  { %3160 = vst [vmem:[#allocation101_spill] sm:$0xff] %v2315_v14  ;;  %3161 = vst [vmem:[#allocation102_spill] sm:$0xff] %v2317_v59 }
 0x140   :  { %848 = vperm.xlu1 %1572, %v1818_v29   ;;  %889 = vperm.xlu0 %1573, %v1847_v34  }
 0x142   :  { %v2321_v16 = vpop.permute.xlu1 %569  ;;  %v2323_v57 = vpop.permute.xlu0 %573 }
 0x143   :  { %3162 = vst [vmem:[#allocation103_spill] sm:$0xff] %v2323_v57 }
 0x144   :  { %854 = vperm.xlu1 %1572, %v1830_v31   ;;  %897 = vperm.xlu0 %1573, %v1859_v36  }
 0x146   :  { %v2327_v53 = vpop.permute.xlu1 %577  ;;  %v2329_v61 = vpop.permute.xlu0 %581 }
 0x147   :  { %3163 = vst [vmem:[#allocation104_spill] sm:$0xff] %v2327_v53  ;;  %3164 = vst [vmem:[#allocation105_spill] sm:$0xff] %v2329_v61 }
 0x148   :  { %893 = vperm.xlu1 %1572, %v1842_v33   ;;  %905 = vperm.xlu0 %1573, %v1871_v38  }
 0x14a   :  { %v2333_v59 = vpop.permute.xlu1 %585  ;;  %v2335_v29 = vpop.permute.xlu0 %589 }
 0x14b   :  { %3165 = vst [vmem:[#allocation106_spill] sm:$0xff] %v2333_v59  ;;  %3166 = vst [vmem:[#allocation107_spill] sm:$0xff] %v2335_v29 }
 0x14c   :  { %901 = vperm.xlu1 %1572, %v1854_v35   ;;  %913 = vperm.xlu0 %1573, %v1883_v40  }
 0x14e   :  { %v2339_v14 = vpop.permute.xlu1 %593  ;;  %v2341_v31 = vpop.permute.xlu0 %597 }
 0x14f   :  { %3167 = vst [vmem:[#allocation108_spill] sm:$0xff] %v2339_v14  ;;  %3168 = vst [vmem:[#allocation109_spill] sm:$0xff] %v2341_v31 }
 0x150   :  { %909 = vperm.xlu1 %1572, %v1866_v37   ;;  %921 = vperm.xlu0 %1573, %v1895_v42  }
 0x152   :  { %v2345_v61 = vpop.permute.xlu1 %601  ;;  %v2347_v53 = vpop.permute.xlu0 %605 }
 0x153   :  { %3169 = vst [vmem:[#allocation110_spill] sm:$0xff] %v2345_v61  ;;  %3170 = vst [vmem:[#allocation111_spill] sm:$0xff] %v2347_v53 }
 0x154   :  { %917 = vperm.xlu1 %1572, %v1878_v39   ;;  %929 = vperm.xlu0 %1573, %v1907_v44  }
 0x156   :  { %v2351_v29 = vpop.permute.xlu1 %609  ;;  %v2353_v59 = vpop.permute.xlu0 %613 }
 0x157   :  { %3171 = vst [vmem:[#allocation112_spill] sm:$0xff] %v2351_v29  ;;  %3172 = vst [vmem:[#allocation113_spill] sm:$0xff] %v2353_v59 }
 0x158   :  { %925 = vperm.xlu1 %1572, %v1890_v41   ;;  %937 = vperm.xlu0 %1573, %v1919_v46   ;;  %v3052_v46 = vmov 3  }
 0x15a   :  { %v2357_v31 = vpop.permute.xlu1 %617  ;;  %v2359_v14 = vpop.permute.xlu0 %621 }
 0x15b   :  { %3173 = vst [vmem:[#allocation114_spill] sm:$0xff] %v2357_v31  ;;  %3174 = vst [vmem:[#allocation115_spill] sm:$0xff] %v2359_v14 }
 0x15c   :  { %933 = vperm.xlu1 %1572, %v1902_v43   ;;  %957 = vperm.xlu0 %1573, %v1938_v49  }
 0x15e   :  { %v2363_v53 = vpop.permute.xlu1 %625  ;;  %v2365_v61 = vpop.permute.xlu0 %629 }
 0x15f   :  { %3175 = vst [vmem:[#allocation116_spill] sm:$0xff] %v2363_v53  ;;  %3176 = vst [vmem:[#allocation117_spill] sm:$0xff] %v2365_v61 }
 0x160   :  { %953 = vperm.xlu1 %1572, %v1943_v50   ;;  %961 = vperm.xlu0 %1573, %v1955_v52  }
 0x162   :  { %v2369_v59 = vpop.permute.xlu1 %633  ;;  %v2371_v29 = vpop.permute.xlu0 %637 }
 0x164   :  { %1574 = vset.pattern.permute.xlu1 %v3052_v46  ;;  %969 = vperm.xlu0 %1573, %v1967_v54  }
 0x165   :  { %1129 = vperm.xlu1 %1574, %v1751_v18  }
 0x166   :  { %v2376_v31 = vpop.permute.xlu1 %641  ;;  %v2378_v53 = vpop.permute.xlu0 %645 }
 0x167   :  { %3177 = vst [vmem:[#allocation118_spill] sm:$0xff] %v2378_v53 }
 0x168   :  { %977 = vperm.xlu0 %1573, %v1979_v56  }
 0x169   :  { %1081 = vperm.xlu1 %1574, %v1655_v1  }
 0x16a   :  { %v2382_v61 = vpop.permute.xlu1 %649  ;;  %v2384_v14 = vpop.permute.xlu0 %653 }
 0x16b   :  { %3178 = vst [vmem:[#allocation119_spill] sm:$0xff] %v2384_v14 }
 0x16c   :  { %985 = vperm.xlu0 %1573, %v1991_v58  }
 0x16d   :  { %1084 = vperm.xlu1 %1574, %v1667_v4   ;;  %v3184_v4 = vmov 2  }
 0x16e   :  { %v2388_v46 = vpop.permute.xlu1 %657  ;;  %v2390_v57 = vpop.permute.xlu0 %661 }
 0x16f   :  { %3179 = vst [vmem:[#allocation120_spill] sm:$0xff] %v2390_v57 }
 0x170   :  { %993 = vperm.xlu0 %1573, %v3125_v47  }
 0x171   :  { %1277 = vperm.xlu1 %1574, %v1938_v49  }
 0x172   :  { %v2394_v18 = vpop.permute.xlu1 %665  ;;  %v2396_v53 = vpop.permute.xlu0 %669 }
 0x173   :  { %3180 = vst [vmem:[#allocation121_spill] sm:$0xff] %v2394_v18  ;;  %3181 = vst [vmem:[#allocation122_spill] sm:$0xff] %v2396_v53  ;;  %v3187_v18 = vmov 3  }
 0x174   :  { %1001 = vperm.xlu0 %1573, %v3129_v55  }
 0x175   :  { %1213 = vperm.xlu1 %1574, %v1842_v33  }
 0x176   :  { %v2400_v1 = vpop.permute.xlu1 %673  ;;  %v2402_v14 = vpop.permute.xlu0 %677 }
 0x177   :  { %3182 = vst [vmem:[#allocation123_spill] sm:$0xff] %v2400_v1  ;;  %3183 = vst [vmem:[#allocation124_spill] sm:$0xff] %v2402_v14 }
 0x178   :  { %1013 = vperm.xlu0 %1573, %v3133_v48  }
 0x179   :  { %1575 = vset.pattern.permute.xlu1 %v3184_v4 }
 0x17a   :  { %v2406_v57 = vpop.permute.xlu1 %681  ;;  %965 = vperm.xlu1 %1575, %v1950_v51   ;;  %v2409_v49 = vpop.permute.xlu0 %685 }
 0x17b   :  { %3185 = vst [vmem:[#allocation125_spill] sm:$0xff] %v2406_v57  ;;  %3186 = vst [vmem:[#allocation126_spill] sm:$0xff] %v2409_v49 }
 0x17c   :  { %1588 = vset.pattern.permute.xlu0 %v3187_v18 }
 0x17d   :  { %1132 = vperm.xlu0 %1588, %v1746_v17  }
 0x17e   :  { %v2413_v53 = vpop.permute.xlu1 %689  ;;  %1576 = vset.pattern.permute.xlu1 %v3187_v18  ;;  %v2416_v33 = vpop.permute.xlu0 %693 }
 0x17f   :  { %3188 = vst [vmem:[#allocation127_spill] sm:$0xff] %v2413_v53  ;;  %3189 = vst [vmem:[#allocation128_spill] sm:$0xff] %v2416_v33  ;;  %1135 = vperm.xlu1 %1576, %v1763_v20  }
 0x181   :  { %1273 = vperm.xlu0 %1588, %v1943_v50  }
 0x183   :  { %1087 = vperm.xlu1 %1576, %v1650_v0   ;;  %v2421_v57 = vpop.permute.xlu1 %761  ;;  %v2423_v14 = vpop.permute.xlu0 %764 }
 0x185   :  { %1209 = vperm.xlu0 %1588, %v1847_v34  }
 0x187   :  { %1090 = vperm.xlu1 %1576, %v1662_v3   ;;  %v2427_v17 = vpop.permute.xlu1 %767  ;;  %v2429_v53 = vpop.permute.xlu0 %773 }
 0x189   :  { %1138 = vperm.xlu0 %1588, %v1758_v19  }
 0x18b   :  { %1285 = vperm.xlu1 %1576, %v1950_v51   ;;  %v2433_v20 = vpop.permute.xlu1 %770  ;;  %v2435_v50 = vpop.permute.xlu0 %779  ;;  %v3191_v51 = vld [vmem:[#allocation7_spill] sm:$0xff] }
 0x18d   :  { %1281 = vperm.xlu0 %1588, %v1955_v52  }
 0x18f   :  { %1221 = vperm.xlu1 %1576, %v1854_v35   ;;  %v2439_v0 = vpop.permute.xlu1 %776  ;;  %v2441_v34 = vpop.permute.xlu0 %785 }
 0x191   :  { %1217 = vperm.xlu0 %1588, %v1859_v36  }
 0x193   :  { %1577 = vset.pattern.permute.xlu1 %v3184_v4  ;;  %v2445_v3 = vpop.permute.xlu1 %782  ;;  %v2447_v19 = vpop.permute.xlu0 %791 }
 0x194   :  { %3190 = vst [vmem:[#allocation129_spill] sm:$0xff] %v2447_v19  ;;  %973 = vperm.xlu1 %1577, %v3191_v51  }
 0x195   :  { %1144 = vperm.xlu0 %1588, %v1770_v21  }
 0x197   :  { %v2451_v33 = vpop.permute.xlu1 %788  ;;  %v2453_v52 = vpop.permute.xlu0 %797 }
 0x198   :  { %3192 = vst [vmem:[#allocation7_spill] sm:$0xff] %v2453_v52  ;;  %1578 = vset.pattern.permute.xlu1 %v3187_v18 }
 0x199   :  { %1141 = vperm.xlu1 %1578, %v1775_v22   ;;  %1289 = vperm.xlu0 %1588, %v1967_v54  }
 0x19b   :  { %v2458_v35 = vpop.permute.xlu1 %794  ;;  %v2460_v36 = vpop.permute.xlu0 %803 }
 0x19c   :  { %3193 = vst [vmem:[#allocation130_spill] sm:$0xff] %v2458_v35  ;;  %3194 = vst [vmem:[#allocation131_spill] sm:$0xff] %v2460_v36 }
 0x19d   :  { %1093 = vperm.xlu1 %1578, %v1679_v6   ;;  %1225 = vperm.xlu0 %1588, %v1871_v38  }
 0x19f   :  { %v2464_v49 = vpop.permute.xlu1 %800  ;;  %v2466_v21 = vpop.permute.xlu0 %809 }
 0x1a0   :  { %3195 = vst [vmem:[#allocation132_spill] sm:$0xff] %v2464_v49 }
 0x1a1   :  { %1096 = vperm.xlu1 %1578, %v1674_v5   ;;  %1150 = vperm.xlu0 %1588, %v1782_v23   ;;  %v3197_v23 = vld [vmem:[#allocation8_spill] sm:$0xff] }
 0x1a3   :  { %v2470_v52 = vpop.permute.xlu1 %806  ;;  %v2472_v22 = vpop.permute.xlu0 %815 }
 0x1a4   :  { %3196 = vst [vmem:[#allocation133_spill] sm:$0xff] %v2470_v52 }
 0x1a5   :  { %1293 = vperm.xlu1 %1578, %v3191_v51   ;;  %1297 = vperm.xlu0 %1588, %v1979_v56  }
 0x1a7   :  { %v2476_v54 = vpop.permute.xlu1 %812  ;;  %v2478_v6 = vpop.permute.xlu0 %821 }
 0x1a9   :  { %1229 = vperm.xlu1 %1578, %v1866_v37   ;;  %1233 = vperm.xlu0 %1588, %v1883_v40  }
 0x1ab   :  { %v2482_v38 = vpop.permute.xlu1 %818  ;;  %v2484_v5 = vpop.permute.xlu0 %827 }
 0x1ad   :  { %1579 = vset.pattern.permute.xlu1 %v3184_v4  ;;  %1156 = vperm.xlu0 %1588, %v1794_v25  }
 0x1ae   :  { %981 = vperm.xlu1 %1579, %v3197_v23  }
 0x1af   :  { %v2489_v51 = vpop.permute.xlu1 %824  ;;  %v2491_v56 = vpop.permute.xlu0 %833 }
 0x1b1   :  { %1305 = vperm.xlu0 %1588, %v1991_v58  }
 0x1b2   :  { %1580 = vset.pattern.permute.xlu1 %v3187_v18 }
 0x1b3   :  { %1147 = vperm.xlu1 %1580, %v1787_v24   ;;  %v2496_v37 = vpop.permute.xlu1 %830  ;;  %v2498_v40 = vpop.permute.xlu0 %839 }
 0x1b5   :  { %1241 = vperm.xlu0 %1588, %v1895_v42  }
 0x1b7   :  { %1099 = vperm.xlu1 %1580, %v1691_v8   ;;  %v2502_v25 = vpop.permute.xlu1 %836  ;;  %v2504_v36 = vpop.permute.xlu0 %845 }
 0x1b9   :  { %1162 = vperm.xlu0 %1588, %v1806_v27  }
 0x1bb   :  { %1102 = vperm.xlu1 %1580, %v1686_v7   ;;  %v2508_v58 = vpop.permute.xlu1 %842  ;;  %v2510_v52 = vpop.permute.xlu0 %851 }
 0x1bc   :  { %3198 = vst [vmem:[#allocation8_spill] sm:$0xff] %v2508_v58  ;;  %3199 = vst [vmem:[#allocation134_spill] sm:$0xff] %v2510_v52 }
 0x1bd   :  { %1313 = vperm.xlu0 %1588, %v3125_v47  }
 0x1bf   :  { %1301 = vperm.xlu1 %1580, %v3197_v23   ;;  %v2514_v24 = vpop.permute.xlu1 %848  ;;  %v2516_v42 = vpop.permute.xlu0 %889  ;;  %v3202_v23 = vld [vmem:[#allocation9_spill] sm:$0xff] }
 0x1c0   :  { %3200 = vst [vmem:[#allocation135_spill] sm:$0xff] %v2514_v24 }
 0x1c1   :  { %1249 = vperm.xlu0 %1588, %v1907_v44  }
 0x1c3   :  { %1237 = vperm.xlu1 %1580, %v1878_v39   ;;  %v2520_v8 = vpop.permute.xlu1 %854  ;;  %v2522_v27 = vpop.permute.xlu0 %897 }
 0x1c4   :  { %3201 = vst [vmem:[#allocation136_spill] sm:$0xff] %v2520_v8  ;;  %v3203_v8 = vld [vmem:[#allocation5_spill] sm:$0xff] }
 0x1c5   :  { %1165 = vperm.xlu0 %1588, %v1823_v30  }
 0x1c7   :  { %1581 = vset.pattern.permute.xlu1 %v3184_v4  ;;  %v2526_v7 = vpop.permute.xlu1 %893  ;;  %v2528_v47 = vpop.permute.xlu0 %905 }
 0x1c8   :  { %989 = vperm.xlu1 %1581, %v3202_v23  }
 0x1c9   :  { %1120 = vperm.xlu0 %1588, %v1722_v13  }
 0x1cb   :  { %v2532_v52 = vpop.permute.xlu1 %901  ;;  %v2534_v44 = vpop.permute.xlu0 %913 }
 0x1cc   :  { %1582 = vset.pattern.permute.xlu1 %v3187_v18 }
 0x1cd   :  { %1153 = vperm.xlu1 %1582, %v1799_v26   ;;  %1325 = vperm.xlu0 %1588, %v3130_v62  }
 0x1cf   :  { %v2539_v30 = vpop.permute.xlu1 %909  ;;  %v2541_v39 = vpop.permute.xlu0 %921 }
 0x1d1   :  { %1105 = vperm.xlu1 %1582, %v1703_v10   ;;  %1261 = vperm.xlu0 %1588, %v3203_v8  }
 0x1d3   :  { %v2545_v49 = vpop.permute.xlu1 %917  ;;  %v2547_v13 = vpop.permute.xlu0 %929 }
 0x1d4   :  { %3204 = vst [vmem:[#allocation9_spill] sm:$0xff] %v2547_v13 }
 0x1d5   :  { %1108 = vperm.xlu1 %1582, %v1698_v9   ;;  %1171 = vperm.xlu0 %1588, %v1835_v32   ;;  %v118_v9 = vlaneseq  ;;  %v3208_v32 = vld [vmem:[#allocation6_spill] sm:$0xff] }
 0x1d7   :  { %v2551_v24 = vpop.permute.xlu1 %925  ;;  %v2553_v26 = vpop.permute.xlu0 %937 }
 0x1d8   :  { %3205 = vst [vmem:[#allocation5_spill] sm:$0xff] %v2551_v24  ;;  %3206 = vst [vmem:[#allocation137_spill] sm:$0xff] %v2553_v26  ;;  %v3209_v26 = vld [vmem:[#allocation10_spill] sm:$0xff] }
 0x1d9   :  { %1309 = vperm.xlu1 %1582, %v3202_v23   ;;  %1126 = vperm.xlu0 %1588, %v1734_v15  }
 0x1db   :  { %v2557_v35 = vpop.permute.xlu1 %933  ;;  %v958_v10 = vpop.permute.xlu0 %957 }
 0x1dc   :  { %3207 = vst [vmem:[#allocation138_spill] sm:$0xff] %v2557_v35  ;;  %v2570_v35 = vand.u32 127, %v118_v9 }
 0x1dd   :  { %1245 = vperm.xlu1 %1582, %v1890_v41   ;;  %1333 = vperm.xlu0 %1588, %v3133_v48  }
 0x1de   :  { %vm878_vm0 = vcmp.eq.s32.totalorder %v2570_v35, %v2484_v5  ;;  %vm880_vm1 = vcmp.eq.s32.totalorder %v2570_v35, %v2491_v56  ;;  %vm882_vm2 = vcmp.eq.s32.totalorder %v2570_v35, %v2498_v40  ;;  %vm884_vm3 = vcmp.eq.s32.totalorder %v2570_v35, %v2504_v36  ;;  %v3213_v40 = vld [vmem:[#allocation16_spill] sm:$0xff] }
 0x1df   :  { %v954_v13 = vpop.permute.xlu1 %953  ;;  %v2561_v19 = vpop.permute.xlu0 %961  ;;  %vm216_vm4 = vcmp.eq.s32.totalorder %v2570_v35, %v3213_v40  ;;  %vm552_vm7 = vcmp.eq.s32.totalorder %v2570_v35, %v2273_v45  ;;  %vm553_vm8 = vcmp.eq.s32.totalorder %v2570_v35, %v2275_v2  ;;  %vm536_vm10 = vcmp.eq.s32.totalorder %v2570_v35, %v2225_v63 }
 0x1e0   :  { %v712_v36 = vsel %vm552_vm7, %v2369_v59, 0.0  ;;  %vm872_vm11 = vcmp.eq.s32.totalorder %v2570_v35, %v2466_v21  ;;  %vm873_vm12 = vcmp.eq.s32.totalorder %v2570_v35, %v2476_v54  ;;  %vm537_vm13 = vcmp.eq.s32.totalorder %v2570_v35, %v2223_v60  ;;  %v3219_v54 = vld [vmem:[#allocation47_spill] sm:$0xff] }
 0x1e1   :  { %1583 = vset.pattern.permute.xlu1 %v3184_v4  ;;  %1269 = vperm.xlu0 %1588, %v3208_v32   ;;  %v1033_v59 = vsel %vm873_vm12, %v958_v10, 0.0  ;;  %v1032_v63 = vsel %vm872_vm11, %v954_v13, 0.0  ;;  %v696_v2 = vsel %vm536_vm10, %v2321_v16, 0.0  ;;  %vm857_vm15 = vcmp.eq.s32.totalorder %v2570_v35, %v2423_v14  ;;  %v3221_v13 = vld [vmem:[#allocation103_spill] sm:$0xff] }
 0x1e2   :  { %997 = vperm.xlu1 %1583, %v3209_v26   ;;  %v697_v10 = vsel %vm537_vm13, %v3221_v13, 0.0  ;;  %v1017_v40 = vsel %vm857_vm15, %v2526_v7, 0.0  ;;  %v3228_v13 = vld [vmem:[#allocation65_spill] sm:$0xff]  ;;  %vm874_vm11 = vcmp.eq.s32.totalorder %v2570_v35, %v2472_v22  ;;  %vm875_vm12 = vcmp.eq.s32.totalorder %v2570_v35, %v2482_v38 }
 0x1e3   :  { %v2566_v23 = vpop.permute.xlu0 %969  ;;  %v3233_v22 = vld [vmem:[#allocation49_spill] sm:$0xff]  ;;  %vm858_vm15 = vcmp.eq.s32.totalorder %v2570_v35, %v2427_v17 }
 0x1e4   :  { %v2568_v15 = vpop.permute.xlu1 %1129 }
 0x1e6   :  { %1584 = vset.pattern.permute.xlu1 %v3187_v18 }
 0x1e7   :  { %1159 = vperm.xlu1 %1584, %v1811_v28   ;;  %v978_v41 = vpop.permute.xlu0 %977 }
 0x1e8   :  { %v2576_v48 = vsel %vm878_vm0, %v978_v41, 0.0  ;;  %v2578_v58 = vpop.permute.xlu1 %1081  ;;  %vm856_vm0 = vcmp.eq.s32.totalorder %v2570_v35, %v2421_v57 }
 0x1eb   :  { %1111 = vperm.xlu1 %1584, %v1715_v12   ;;  %v986_v32 = vpop.permute.xlu0 %985 }
 0x1ec   :  { %v2583_v9 = vsel %vm880_vm1, %v986_v32, 0.0  ;;  %v1085_v1 = vpop.permute.xlu1 %1084  ;;  %vm1192_vm1 = vcmp.eq.s32.totalorder %v2570_v35, %v2568_v15 }
 0x1ef   :  { %1114 = vperm.xlu1 %1584, %v1710_v11   ;;  %v994_v28 = vpop.permute.xlu0 %993 }
 0x1f0   :  { %v2588_v5 = vsel %vm882_vm2, %v994_v28, 0.0  ;;  %v1278_v41 = vpop.permute.xlu1 %1277  ;;  %v3214_v28 = vld [vmem:[#allocation18_spill] sm:$0xff]  ;;  %vm1177_vm2 = vcmp.eq.s32.totalorder %v2570_v35, %v1085_v1  ;;  %v3224_v1 = vld [vmem:[#allocation33_spill] sm:$0xff] }
 0x1f1   :  { %3210 = vst [vmem:[#allocation6_spill] sm:$0xff] %v2588_v5  ;;  %vm217_vm5 = vcmp.eq.s32.totalorder %v2570_v35, %v3214_v28  ;;  %v3215_v5 = vld [vmem:[#allocation31_spill] sm:$0xff] }
 0x1f2   :  { %vm233_vm6 = vcmp.eq.s32.totalorder %v2570_v35, %v3215_v5 }
 0x1f3   :  { %1317 = vperm.xlu1 %1584, %v3209_v26   ;;  %v1002_v56 = vpop.permute.xlu0 %1001  ;;  %v713_v26 = vsel %vm553_vm8, %v2371_v29, 0.0 }
 0x1f4   :  { %v2593_v12 = vsel %vm884_vm3, %v1002_v56, 0.0  ;;  %v1214_v32 = vpop.permute.xlu1 %1213  ;;  %v3217_v56 = vld [vmem:[#allocation63_spill] sm:$0xff] }
 0x1f5   :  { %3211 = vst [vmem:[#allocation10_spill] sm:$0xff] %v2593_v12  ;;  %v425_v5 = vsel %vm233_vm6, %v3217_v56, 0.0  ;;  %v1337_v15 = vsel %vm1177_vm2, %v1214_v32, 0.0  ;;  %vm235_vm6 = vcmp.eq.s32.totalorder %v2570_v35, %v3224_v1  ;;  %v1590_v32 = vld [vmem:[%s3014_s1 + $0xe8] sm:$0xff] }
 0x1f6   :  { %v3236_v1 = vld [vmem:[#allocation105_spill] sm:$0xff] }
 0x1f7   :  { %1253 = vperm.xlu1 %1584, %v1902_v43   ;;  %v2596_v24 = vpop.permute.xlu0 %1013  ;;  %v3216_v43 = vld [vmem:[#allocation32_spill] sm:$0xff] }
 0x1f8   :  { %3212 = vst [vmem:[#allocation139_spill] sm:$0xff] %v2596_v24  ;;  %vm232_vm9 = vcmp.eq.s32.totalorder %v2570_v35, %v3216_v43  ;;  %v3218_v24 = vld [vmem:[#allocation64_spill] sm:$0xff] }
 0x1f9   :  { %v2600_v11 = vpop.permute.xlu1 %965  ;;  %v424_v12 = vsel %vm232_vm9, %v3218_v24, 0.0  ;;  %v745_v24 = vadd.f32 %v713_v26, %v425_v5  ;;  %v3220_v43 = vld [vmem:[#allocation48_spill] sm:$0xff]  ;;  %v1016_v26 = vsel %vm856_vm0, %v2516_v42, 0.0  ;;  %vm859_vm0 = vcmp.eq.s32.totalorder %v2570_v35, %v2433_v20 }
 0x1fa   :  { %v744_v29 = vadd.f32 %v712_v36, %v424_v12  ;;  %v408_v60 = vsel %vm216_vm4, %v3220_v43, 0.0  ;;  %vm1176_vm4 = vcmp.eq.s32.totalorder %v2570_v35, %v2578_v58  ;;  %v3226_v58 = vld [vmem:[#allocation89_spill] sm:$0xff] }
 0x1fb   :  { %1585 = vset.pattern.permute.xlu1 %v3184_v4  ;;  %v1065_v12 = vadd.f32 %v1033_v59, %v745_v24  ;;  %v728_v36 = vadd.f32 %v696_v2, %v408_v60  ;;  %v3222_v59 = vld [vmem:[#allocation15_spill] sm:$0xff]  ;;  %v3223_v2 = vld [vmem:[#allocation17_spill] sm:$0xff]  ;;  %vm554_vm8 = vcmp.eq.s32.totalorder %v2570_v35, %v3226_v58 }
 0x1fc   :  { %1005 = vperm.xlu1 %1585, %v3130_v62   ;;  %v1133_v45 = vpop.permute.xlu0 %1132  ;;  %v409_v62 = vsel %vm217_vm5, %v3219_v54, 0.0  ;;  %v1064_v14 = vadd.f32 %v1032_v63, %v744_v29  ;;  %vm218_vm3 = vcmp.eq.s32.totalorder %v2570_v35, %v3222_v59  ;;  %vm219_vm5 = vcmp.eq.s32.totalorder %v2570_v35, %v3223_v2  ;;  %v3225_v29 = vld [vmem:[#allocation34_spill] sm:$0xff] }
 0x1fd   :  { %vm1193_vm14 = vcmp.eq.s32.totalorder %v2570_v35, %v1133_v45  ;;  %v729_v5 = vadd.f32 %v697_v10, %v409_v62  ;;  %v1048_v63 = vadd.f32 %v1016_v26, %v728_v36  ;;  %vm234_vm7 = vcmp.eq.s32.totalorder %v2570_v35, %v3225_v29  ;;  %v3227_v54 = vld [vmem:[#allocation90_spill] sm:$0xff]  ;;  %v3231_v26 = vld [vmem:[#allocation76_spill] sm:$0xff] }
 0x1fe   :  { %v2630_v21 = vpop.permute.xlu1 %1135  ;;  %v1353_v16 = vsel %vm1193_vm14, %v1278_v41, 0.0  ;;  %vm555_vm9 = vcmp.eq.s32.totalorder %v2570_v35, %v3227_v54  ;;  %v427_v10 = vsel %vm235_vm6, %v3228_v13, 0.0  ;;  %vm539_vm10 = vcmp.eq.s32.totalorder %v2570_v35, %v3231_v26 }
 0x1ff   :  { %v1385_v57 = vadd.f32 %v1353_v16, %v1065_v12  ;;  %v3229_v16 = vld [vmem:[#allocation66_spill] sm:$0xff]  ;;  %v411_v38 = vsel %vm219_vm5, %v3233_v22, 0.0  ;;  %v699_v29 = vsel %vm539_vm10, %v3236_v1, 0.0  ;;  %v1018_v54 = vsel %vm858_vm15, %v2522_v27, 0.0  ;;  %v3240_v22 = vld [vmem:[#allocation91_spill] sm:$0xff] }
 0x200   :  { %941 = vperm.xlu1 %1585, %v3203_v8   ;;  %v1274_v28 = vpop.permute.xlu0 %1273  ;;  %v1049_v8 = vadd.f32 %v1017_v40, %v729_v5  ;;  %v426_v12 = vsel %vm234_vm7, %v3229_v16, 0.0  ;;  %v3232_v5 = vld [vmem:[#allocation14_spill] sm:$0xff]  ;;  %v731_v13 = vadd.f32 %v699_v29, %v411_v38  ;;  %vm556_vm7 = vcmp.eq.s32.totalorder %v2570_v35, %v3240_v22  ;;  %v3241_v38 = vld [vmem:[#allocation92_spill] sm:$0xff] }
 0x201   :  { %v1352_v56 = vsel %vm1192_vm1, %v1274_v28, 0.0  ;;  %v3230_v28 = vld [vmem:[#allocation118_spill] sm:$0xff]  ;;  %vm538_vm13 = vcmp.eq.s32.totalorder %v2570_v35, %v3232_v5  ;;  %vm1194_vm1 = vcmp.eq.s32.totalorder %v2570_v35, %v2630_v21  ;;  %vm860_vm15 = vcmp.eq.s32.totalorder %v2570_v35, %v2429_v53 }
 0x202   :  { %v1384_v41 = vadd.f32 %v1352_v56, %v1064_v14  ;;  %v2649_v45 = vpop.permute.xlu1 %1087  ;;  %v1369_v62 = vadd.f32 %v1337_v15, %v1049_v8  ;;  %v714_v14 = vsel %vm554_vm8, %v2376_v31, 0.0  ;;  %v715_v36 = vsel %vm555_vm9, %v3230_v28, 0.0  ;;  %v3234_v15 = vld [vmem:[#allocation104_spill] sm:$0xff]  ;;  %v2725_v5 = vld [vmem:[%s3015_s2 + $0x70] sm:$0xff] }
 0x203   :  { %v1035_v31 = vsel %vm875_vm12, %v2600_v11, 0.0  ;;  %v746_v8 = vadd.f32 %v714_v14, %v426_v12  ;;  %vm557_vm8 = vcmp.eq.s32.totalorder %v2570_v35, %v3241_v38  ;;  %v3245_v29 = vld [vmem:[#allocation78_spill] sm:$0xff]  ;;  %vm877_vm12 = vcmp.eq.s32.totalorder %v2570_v35, %v2489_v51 }
 0x204   :  { %1586 = vset.pattern.permute.xlu1 %v3187_v18  ;;  %v1210_v42 = vpop.permute.xlu0 %1209  ;;  %v1530_v7 = vpack.c.bf16 %v1385_v57, %v1384_v41  ;;  %v1034_v41 = vsel %vm874_vm11, %v2561_v19, 0.0  ;;  %v1591_v57 = vld [vmem:[%s3014_s1 + $0x60] sm:$0xff]  ;;  %v3235_v19 = vld [vmem:[#allocation50_spill] sm:$0xff]  ;;  %vm541_vm10 = vcmp.eq.s32.totalorder %v2570_v35, %v3245_v29  ;;  %vm876_vm11 = vcmp.eq.s32.totalorder %v2570_v35, %v2478_v6  ;;  %v3248_v6 = vld [vmem:[#allocation51_spill] sm:$0xff] }
 0x205   :  { %v1336_v24 = vsel %vm1176_vm4, %v1210_v42, 0.0  ;;  %1168 = vperm.xlu1 %1586, %v1590_v32   ;;  %v747_v42 = vadd.f32 %v715_v36, %v427_v10  ;;  %v410_v11 = vsel %vm218_vm3, %v3235_v19, 0.0  ;;  %vm1178_vm3 = vcmp.eq.s32.totalorder %v2570_v35, %v2649_v45  ;;  %v3257_v29 = vld [vmem:[#allocation120_spill] sm:$0xff] }
 0x206   :  { %v1368_v43 = vadd.f32 %v1336_v24, %v1048_v63  ;;  %v1091_v60 = vpop.permute.xlu1 %1090  ;;  %1531 = vmatprep.subr.bf16.mxu0 %v1530_v7  ;;  %v698_v63 = vsel %vm538_vm13, %v3234_v15, 0.0  ;;  %v1066_v24 = vadd.f32 %v1034_v41, %v746_v8  ;;  %v3242_v8 = vld [vmem:[#allocation36_spill] sm:$0xff]  ;;  %v716_v19 = vsel %vm556_vm7, %v2382_v61, 0.0 }
 0x207   :  { %v1067_v32 = vadd.f32 %v1035_v31, %v747_v42  ;;  %v730_v59 = vadd.f32 %v698_v63, %v410_v11  ;;  %vm1179_vm2 = vcmp.eq.s32.totalorder %v2570_v35, %v1091_v60  ;;  %v3237_v31 = vld [vmem:[#allocation19_spill] sm:$0xff]  ;;  %vm236_vm9 = vcmp.eq.s32.totalorder %v2570_v35, %v3242_v8  ;;  %v1402_v8 = vld [vmem:[%s3013_s0 + $0x8] sm:$0xff] }
 0x208   :  { %v1139_v40 = vpop.permute.xlu0 %1138  ;;  %v1532_v56 = vpack.c.bf16 %v1369_v62, %v1368_v43  ;;  %v1019_v62 = vsel %vm859_vm0, %v2532_v52, 0.0  ;;  %v1592_v52 = vld [vmem:[%s3015_s2 + $0x60] sm:$0xff]  ;;  %vm221_vm4 = vcmp.eq.s32.totalorder %v2570_v35, %v3237_v31  ;;  %v1595_v63 = vld [vmem:[%s3015_s2 + $0x78] sm:$0xff]  ;;  %v1036_v61 = vsel %vm876_vm11, %v2566_v23, 0.0  ;;  %1467 = vmatprep.mubr.f32.mxu0 %v1402_v8 }
 0x209   :  { %vm1195_vm14 = vcmp.eq.s32.totalorder %v2570_v35, %v1139_v40  ;;  %1117 = vperm.xlu1 %1586, %v1591_v57   ;;  %v1050_v12 = vadd.f32 %v1018_v54, %v730_v59  ;;  %v1051_v14 = vadd.f32 %v1019_v62, %v731_v13  ;;  %v2719_v40 = vld [vmem:[%s3015_s2 + $0xf0] sm:$0xff]  ;;  %v3239_v57 = vld [vmem:[#allocation35_spill] sm:$0xff]  ;;  %v413_v51 = vsel %vm221_vm4, %v3248_v6, 0.0  ;;  %v3270_v8 = vld [vmem:[#allocation24_spill] sm:$0xff] }
 0x20a   :  { %v1286_v7 = vpop.permute.xlu1 %1285  ;;  %1533 = vmatpush3.bf16.msra.mxu0 %v1532_v56  ;;  %vm237_vm6 = vcmp.eq.s32.totalorder %v2570_v35, %v3239_v57  ;;  %v3243_v42 = vld [vmem:[#allocation67_spill] sm:$0xff]  ;;  %vm879_vm11 = vcmp.eq.s32.totalorder %v2570_v35, %v2496_v37 }
 0x20b   :  { %v1355_v2 = vsel %vm1195_vm14, %v1286_v7, 0.0  ;;  %v429_v7 = vsel %vm237_vm6, %v3243_v42, 0.0  ;;  %v3244_v11 = vld [vmem:[#allocation119_spill] sm:$0xff] }
 0x20c   :  { %v1282_v58 = vpop.permute.xlu0 %1281  ;;  %v1387_v17 = vadd.f32 %v1355_v2, %v1067_v32  ;;  %v717_v1 = vsel %vm557_vm8, %v3244_v11, 0.0  ;;  %v3255_v11 = vld [vmem:[#allocation22_spill] sm:$0xff] }
 0x20d   :  { %v1354_v43 = vsel %vm1194_vm1, %v1282_v58, 0.0  ;;  %1321 = vperm.xlu1 %1586, %v3129_v55   ;;  %v3247_v58 = vld [vmem:[#allocation77_spill] sm:$0xff]  ;;  %v749_v62 = vadd.f32 %v717_v1, %v429_v7  ;;  %vm861_vm1 = vcmp.eq.s32.totalorder %v2570_v35, %v2439_v0  ;;  %vm222_vm7 = vcmp.eq.s32.totalorder %v2570_v35, %v3255_v11 }
 0x20e   :  { %v1386_v10 = vadd.f32 %v1354_v43, %v1066_v24  ;;  %v1222_v20 = vpop.permute.xlu1 %1221  ;;  %v3246_v24 = vld [vmem:[#allocation68_spill] sm:$0xff]  ;;  %vm540_vm14 = vcmp.eq.s32.totalorder %v2570_v35, %v3247_v58  ;;  %v3249_v43 = vld [vmem:[#allocation106_spill] sm:$0xff]  ;;  %v3252_v7 = vld [vmem:[#allocation21_spill] sm:$0xff] }
 0x20f   :  { %v1339_v16 = vsel %vm1179_vm2, %v1222_v20, 0.0  ;;  %v428_v32 = vsel %vm236_vm9, %v3246_v24, 0.0  ;;  %v700_v13 = vsel %vm540_vm14, %v3249_v43, 0.0  ;;  %v1596_v20 = vld [vmem:[%s3014_s1 + $0xf8] sm:$0xff]  ;;  %vm223_vm4 = vcmp.eq.s32.totalorder %v2570_v35, %v3252_v7  ;;  %v3258_v24 = vld [vmem:[#allocation38_spill] sm:$0xff]  ;;  %v3272_v7 = vld [vmem:[#allocation121_spill] sm:$0xff] }
 0x210   :  { %v1534_v21 = vpack.c.bf16 %v1387_v17, %v1386_v10  ;;  %v1218_v28 = vpop.permute.xlu0 %1217  ;;  %v1371_v55 = vadd.f32 %v1339_v16, %v1051_v14  ;;  %v748_v54 = vadd.f32 %v716_v19, %v428_v32  ;;  %v3250_v17 = vld [vmem:[#allocation107_spill] sm:$0xff]  ;;  %v3253_v19 = vld [vmem:[#allocation93_spill] sm:$0xff]  ;;  %vm238_vm9 = vcmp.eq.s32.totalorder %v2570_v35, %v3258_v24  ;;  %v3259_v32 = vld [vmem:[#allocation80_spill] sm:$0xff] }
 0x211   :  { %v1338_v27 = vsel %vm1178_vm3, %v1218_v28, 0.0  ;;  %1257 = vperm.xlu1 %1586, %v1592_v52   ;;  %v701_v23 = vsel %vm541_vm10, %v3250_v17, 0.0  ;;  %v1021_v52 = vsel %vm861_vm1, %v2539_v30, 0.0  ;;  %vm543_vm10 = vcmp.eq.s32.totalorder %v2570_v35, %v3259_v32  ;;  %v3263_v17 = vld [vmem:[#allocation53_spill] sm:$0xff]  ;;  %v3276_v24 = vld [vmem:[#allocation55_spill] sm:$0xff] }
 0x212   :  { %v1370_v36 = vadd.f32 %v1338_v27, %v1050_v12  ;;  %1535 = vmatprep.subr.bf16.mxu0 %v1534_v21  ;;  %v3251_v21 = vld [vmem:[#allocation52_spill] sm:$0xff]  ;;  %v1020_v27 = vsel %vm860_vm15, %v2528_v47, 0.0  ;;  %vm862_vm14 = vcmp.eq.s32.totalorder %v2570_v35, %v2435_v50  ;;  %v415_v37 = vsel %vm223_vm4, %v3263_v17, 0.0 }
 0x213   :  { %v974_v60 = vpop.permute.xlu1 %973 }
 0x214   :  { %v1536_v26 = vpack.c.bf16 %v1371_v55, %v1370_v36  ;;  %v1145_v45 = vpop.permute.xlu0 %1144  ;;  %v1037_v59 = vsel %vm877_vm12, %v974_v60, 0.0  ;;  %v733_v36 = vadd.f32 %v701_v23, %v413_v51  ;;  %v3264_v23 = vld [vmem:[#allocation108_spill] sm:$0xff] }
 0x215   :  { %1587 = vset.pattern.permute.xlu1 %v3184_v4  ;;  %v3238_v4 = vld [vmem:[#allocation20_spill] sm:$0xff]  ;;  %vm1197_vm0 = vcmp.eq.s32.totalorder %v2570_v35, %v1145_v45  ;;  %v1069_v16 = vadd.f32 %v1037_v59, %v749_v62  ;;  %v3260_v59 = vld [vmem:[#allocation69_spill] sm:$0xff]  ;;  %v3261_v62 = vld [vmem:[#allocation70_spill] sm:$0xff] }
 0x216   :  { %1009 = vperm.xlu1 %1587, %v2719_v40   ;;  %1537 = vmatpush3.bf16.msra.mxu0 %v1536_v26  ;;  %vm220_vm5 = vcmp.eq.s32.totalorder %v2570_v35, %v3238_v4  ;;  %v1053_v4 = vadd.f32 %v1021_v52, %v733_v36  ;;  %v430_v6 = vsel %vm238_vm9, %v3261_v62, 0.0 }
 0x217   :  { %v412_v28 = vsel %vm220_vm5, %v3251_v21, 0.0  ;;  %vm558_vm5 = vcmp.eq.s32.totalorder %v2570_v35, %v3253_v19  ;;  %v3266_v21 = vld [vmem:[#allocation54_spill] sm:$0xff] }
 0x218   :  { %v1142_v56 = vpop.permute.xlu1 %1141  ;;  %v1290_v15 = vpop.permute.xlu0 %1289  ;;  %v732_v55 = vadd.f32 %v700_v13, %v412_v28  ;;  %v718_v1 = vsel %vm558_vm5, %v2388_v46, 0.0  ;;  %v3262_v46 = vld [vmem:[#allocation79_spill] sm:$0xff]  ;;  %v414_v28 = vsel %vm222_vm7, %v3266_v21, 0.0 }
 0x219   :  { %vm1196_vm13 = vcmp.eq.s32.totalorder %v2570_v35, %v1142_v56  ;;  %v750_v43 = vadd.f32 %v718_v1, %v430_v6  ;;  %v3275_v1 = vld [vmem:[#allocation82_spill] sm:$0xff]  ;;  %v3279_v6 = vld [vmem:[#allocation81_spill] sm:$0xff] }
 0x21a   :  { %945 = vperm.xlu1 %1587, %v2725_v5   ;;  %v1356_v10 = vsel %vm1196_vm13, %v1290_v15, 0.0  ;;  %v1052_v31 = vadd.f32 %v1020_v27, %v732_v55  ;;  %vm542_vm13 = vcmp.eq.s32.totalorder %v2570_v35, %v3262_v46  ;;  %v1022_v27 = vsel %vm862_vm14, %v2534_v44, 0.0 }
 0x21b   :  { %vm545_vm9 = vcmp.eq.s32.totalorder %v2570_v35, %v3275_v1  ;;  %vm865_vm14 = vcmp.eq.s32.totalorder %v2570_v35, %v2451_v33 }
 0x21c   :  { %v1094_v41 = vpop.permute.xlu1 %1093  ;;  %v1226_v12 = vpop.permute.xlu0 %1225 }
 0x21d   :  { %vm1180_vm2 = vcmp.eq.s32.totalorder %v2570_v35, %v1094_v41  ;;  %v1597_v41 = vld [vmem:[%s3014_s1 + $0x70] sm:$0xff] }
 0x21e   :  { %949 = vperm.xlu1 %1587, %v1595_v63   ;;  %v1340_v56 = vsel %vm1180_vm2, %v1226_v12, 0.0  ;;  %v1070_v12 = vadd.f32 %v2576_v48, %v750_v43  ;;  %v3280_v43 = vld [vmem:[#allocation110_spill] sm:$0xff] }
 0x21f   :  { %v1372_v57 = vadd.f32 %v1340_v56, %v1052_v31 }
 0x220   :  { %v1097_v2 = vpop.permute.xlu1 %1096  ;;  %v1151_v63 = vpop.permute.xlu0 %1150 }
 0x221   :  { %vm1181_vm3 = vcmp.eq.s32.totalorder %v2570_v35, %v1097_v2  ;;  %vm1199_vm15 = vcmp.eq.s32.totalorder %v2570_v35, %v1151_v63  ;;  %v3269_v63 = vld [vmem:[#allocation96_spill] sm:$0xff] }
 0x222   :  { %1589 = vset.pattern.permute.xlu1 %v3187_v18  ;;  %v1068_v18 = vadd.f32 %v1036_v61, %v748_v54  ;;  %vm561_vm5 = vcmp.eq.s32.totalorder %v2570_v35, %v3269_v63  ;;  %v3292_v63 = vld [vmem:[#allocation57_spill] sm:$0xff] }
 0x223   :  { %1174 = vperm.xlu1 %1589, %v1596_v20   ;;  %v3265_v20 = vld [vmem:[#allocation109_spill] sm:$0xff] }
 0x224   :  { %v1294_v14 = vpop.permute.xlu1 %1293  ;;  %v1388_v60 = vadd.f32 %v1356_v10, %v1068_v18  ;;  %v1298_v58 = vpop.permute.xlu0 %1297  ;;  %v702_v10 = vsel %vm542_vm13, %v3264_v23, 0.0  ;;  %v703_v18 = vsel %vm543_vm10, %v3265_v20, 0.0  ;;  %vm881_vm10 = vcmp.eq.s32.totalorder %v2570_v35, %v2502_v25 }
 0x225   :  { %v1357_v0 = vsel %vm1197_vm0, %v1294_v14, 0.0  ;;  %vm863_vm0 = vcmp.eq.s32.totalorder %v2570_v35, %v2445_v3  ;;  %v734_v55 = vadd.f32 %v702_v10, %v414_v28  ;;  %v735_v36 = vadd.f32 %v703_v18, %v415_v37  ;;  %v3282_v18 = vld [vmem:[#allocation56_spill] sm:$0xff] }
 0x226   :  { %v1389_v26 = vadd.f32 %v1357_v0, %v1069_v16  ;;  %v1023_v52 = vsel %vm863_vm0, %v2545_v49, 0.0  ;;  %vm864_vm13 = vcmp.eq.s32.totalorder %v2570_v35, %v2441_v34 }
 0x227   :  { %1123 = vperm.xlu1 %1589, %v1597_v41   ;;  %v1054_v56 = vadd.f32 %v1022_v27, %v734_v55  ;;  %v1055_v41 = vadd.f32 %v1023_v52, %v735_v36 }
 0x228   :  { %v1538_v53 = vpack.c.bf16 %v1389_v26, %v1388_v60  ;;  %v1230_v47 = vpop.permute.xlu1 %1229  ;;  %v1234_v60 = vpop.permute.xlu0 %1233 }
 0x229   :  { %v1341_v30 = vsel %vm1181_vm3, %v1230_v47, 0.0 }
 0x22a   :  { %v1373_v45 = vadd.f32 %v1341_v30, %v1053_v4  ;;  %1539 = vmatprep.subr.bf16.mxu0 %v1538_v53 }
 0x22b   :  { %1329 = vperm.xlu1 %1589, %v2719_v40   ;;  %v3254_v40 = vld [vmem:[#allocation94_spill] sm:$0xff] }
 0x22c   :  { %v1540_v22 = vpack.c.bf16 %v1373_v45, %v1372_v57  ;;  %vm559_vm6 = vcmp.eq.s32.totalorder %v2570_v35, %v3254_v40  ;;  %v1157_v45 = vpop.permute.xlu0 %1156  ;;  %v3273_v40 = vld [vmem:[#allocation122_spill] sm:$0xff] }
 0x22d   :  { %v982_v38 = vpop.permute.xlu1 %981  ;;  %v719_v2 = vsel %vm559_vm6, %v3257_v29, 0.0  ;;  %vm224_vm6 = vcmp.eq.s32.totalorder %v2570_v35, %v3270_v8  ;;  %v721_v11 = vsel %vm561_vm5, %v3273_v40, 0.0  ;;  %v3294_v40 = vld [vmem:[#allocation73_spill] sm:$0xff] }
 0x22e   :  { %1541 = vmatpush3.bf16.msra.mxu0 %v1540_v22  ;;  %v1039_v51 = vsel %vm879_vm11, %v982_v38, 0.0  ;;  %v3267_v38 = vld [vmem:[#allocation23_spill] sm:$0xff]  ;;  %v416_v34 = vsel %vm224_vm6, %v3282_v18, 0.0  ;;  %v3305_v18 = vld [vmem:[#allocation138_spill] sm:$0xff] }
 0x22f   :  { %1265 = vperm.xlu1 %1589, %v2725_v5   ;;  %v3256_v5 = vld [vmem:[#allocation37_spill] sm:$0xff]  ;;  %vm225_vm3 = vcmp.eq.s32.totalorder %v2570_v35, %v3267_v38 }
 0x230   :  { %vm239_vm8 = vcmp.eq.s32.totalorder %v2570_v35, %v3256_v5  ;;  %v3274_v5 = vld [vmem:[#allocation40_spill] sm:$0xff]  ;;  %v1306_v29 = vpop.permute.xlu0 %1305  ;;  %v417_v32 = vsel %vm225_vm3, %v3276_v24, 0.0 }
 0x231   :  { %v431_v54 = vsel %vm239_vm8, %v3260_v59, 0.0  ;;  %vm240_vm8 = vcmp.eq.s32.totalorder %v2570_v35, %v3274_v5  ;;  %v3278_v59 = vld [vmem:[#allocation72_spill] sm:$0xff]  ;;  %v3295_v5 = vld [vmem:[#allocation74_spill] sm:$0xff] }
 0x232   :  { %v1148_v15 = vpop.permute.xlu1 %1147  ;;  %v751_v13 = vadd.f32 %v719_v2, %v431_v54  ;;  %v432_v54 = vsel %vm240_vm8, %v3278_v59, 0.0  ;;  %v3297_v24 = vld [vmem:[#allocation84_spill] sm:$0xff] }
 0x233   :  { %vm1198_vm12 = vcmp.eq.s32.totalorder %v2570_v35, %v1148_v15  ;;  %v3268_v15 = vld [vmem:[#allocation95_spill] sm:$0xff]  ;;  %v3299_v59 = vld [vmem:[#allocation112_spill] sm:$0xff] }
 0x234   :  { %v1358_v16 = vsel %vm1198_vm12, %v1298_v58, 0.0  ;;  %v1071_v14 = vadd.f32 %v1039_v51, %v751_v13  ;;  %vm560_vm4 = vcmp.eq.s32.totalorder %v2570_v35, %v3268_v15  ;;  %v3277_v58 = vld [vmem:[#allocation71_spill] sm:$0xff]  ;;  %vm544_vm12 = vcmp.eq.s32.totalorder %v2570_v35, %v3279_v6  ;;  %v1242_v28 = vpop.permute.xlu0 %1241  ;;  %v3291_v15 = vld [vmem:[#allocation42_spill] sm:$0xff] }
 0x235   :  { %v1390_v3 = vadd.f32 %v1358_v16, %v1070_v12  ;;  %v720_v19 = vsel %vm560_vm4, %v3272_v7, 0.0  ;;  %v704_v25 = vsel %vm544_vm12, %v3280_v43, 0.0  ;;  %v3281_v13 = vld [vmem:[#allocation111_spill] sm:$0xff]  ;;  %v1024_v16 = vsel %vm864_vm13, %v2541_v39, 0.0  ;;  %v3283_v12 = vld [vmem:[#allocation5_spill] sm:$0xff]  ;;  %v3293_v7 = vld [vmem:[#allocation8_spill] sm:$0xff] }
 0x236   :  { %v1100_v42 = vpop.permute.xlu1 %1099  ;;  %v752_v46 = vadd.f32 %v720_v19, %v432_v54  ;;  %v705_v17 = vsel %vm545_vm9, %v3281_v13, 0.0  ;;  %v736_v33 = vadd.f32 %v704_v25, %v416_v34  ;;  %vm883_vm8 = vcmp.eq.s32.totalorder %v2570_v35, %v3293_v7  ;;  %v3302_v43 = vld [vmem:[#allocation6_spill] sm:$0xff] }
 0x237   :  { %vm1182_vm1 = vcmp.eq.s32.totalorder %v2570_v35, %v1100_v42  ;;  %v3271_v42 = vld [vmem:[#allocation39_spill] sm:$0xff]  ;;  %v737_v21 = vadd.f32 %v705_v17, %v417_v32 }
 0x238   :  { %v1342_v48 = vsel %vm1182_vm1, %v1234_v60, 0.0  ;;  %vm241_vm7 = vcmp.eq.s32.totalorder %v2570_v35, %v3271_v42  ;;  %v1072_v23 = vadd.f32 %v2583_v9, %v752_v46  ;;  %v3301_v46 = vld [vmem:[#allocation130_spill] sm:$0xff] }
 0x239   :  { %v1374_v47 = vadd.f32 %v1342_v48, %v1054_v56  ;;  %vm867_vm13 = vcmp.eq.s32.totalorder %v2570_v35, %v3301_v46 }
 0x23a   :  { %v1103_v61 = vpop.permute.xlu1 %1102  ;;  %v1027_v34 = vsel %vm867_vm13, %v3305_v18, 0.0 }
 0x23b   :  { %vm1183_vm2 = vcmp.eq.s32.totalorder %v2570_v35, %v1103_v61  ;;  %v433_v61 = vsel %vm241_vm7, %v3277_v58, 0.0  ;;  %vm242_vm7 = vcmp.eq.s32.totalorder %v2570_v35, %v3291_v15  ;;  %v3315_v15 = vld [vmem:[#allocation115_spill] sm:$0xff] }
 0x23c   :  { %v753_v51 = vadd.f32 %v721_v11, %v433_v61  ;;  %v434_v1 = vsel %vm242_vm7, %v3295_v5, 0.0  ;;  %v3298_v61 = vld [vmem:[#allocation129_spill] sm:$0xff] }
 0x23d   :  { %vm866_vm12 = vcmp.eq.s32.totalorder %v2570_v35, %v3298_v61  ;;  %v3321_v61 = vld [vmem:[#allocation132_spill] sm:$0xff] }
 0x23e   :  { %v1302_v50 = vpop.permute.xlu1 %1301 }
 0x23f   :  { %v1359_v0 = vsel %vm1199_vm15, %v1302_v50, 0.0  ;;  %vm1201_vm15 = vcmp.eq.s32.totalorder %v2570_v35, %v1157_v45 }
 0x240   :  { %v1391_v26 = vadd.f32 %v1359_v0, %v1071_v14  ;;  %v1025_v14 = vsel %vm865_vm14, %v3283_v12, 0.0  ;;  %v1056_v0 = vadd.f32 %v1024_v16, %v736_v33 }
 0x241   :  { %v1057_v55 = vadd.f32 %v1025_v14, %v737_v21 }
 0x242   :  { %v1542_v31 = vpack.c.bf16 %v1391_v26, %v1390_v3  ;;  %v1238_v4 = vpop.permute.xlu1 %1237 }
 0x243   :  { %v1343_v53 = vsel %vm1183_vm2, %v1238_v4, 0.0 }
 0x244   :  { %v1375_v30 = vadd.f32 %v1343_v53, %v1055_v41  ;;  %1543 = vmatprep.subr.bf16.mxu0 %v1542_v31  ;;  %v1163_v31 = vpop.permute.xlu0 %1162  ;;  %v3284_v53 = vld [vmem:[#allocation25_spill] sm:$0xff] }
 0x245   :  { %vm227_vm2 = vcmp.eq.s32.totalorder %v2570_v35, %v3284_v53  ;;  %vm1203_vm14 = vcmp.eq.s32.totalorder %v2570_v35, %v1163_v31  ;;  %v3306_v31 = vld [vmem:[#allocation27_spill] sm:$0xff] }
 0x246   :  { %v1544_v44 = vpack.c.bf16 %v1375_v30, %v1374_v47  ;;  %v3285_v47 = vld [vmem:[#allocation97_spill] sm:$0xff]  ;;  %v3286_v30 = vld [vmem:[#allocation98_spill] sm:$0xff]  ;;  %v419_v8 = vsel %vm227_vm2, %v3292_v63, 0.0  ;;  %v3308_v53 = vld [vmem:[#allocation99_spill] sm:$0xff] }
 0x247   :  { %v990_v57 = vpop.permute.xlu1 %989  ;;  %vm562_vm3 = vcmp.eq.s32.totalorder %v2570_v35, %v3285_v47  ;;  %vm563_vm4 = vcmp.eq.s32.totalorder %v2570_v35, %v3286_v30  ;;  %v3309_v47 = vld [vmem:[#allocation100_spill] sm:$0xff]  ;;  %v3310_v30 = vld [vmem:[#allocation43_spill] sm:$0xff] }
 0x248   :  { %1545 = vmatpush3.bf16.msra.mxu0 %v1544_v44  ;;  %v1041_v62 = vsel %vm881_vm10, %v990_v57, 0.0  ;;  %v3287_v44 = vld [vmem:[#allocation26_spill] sm:$0xff]  ;;  %v3288_v57 = vld [vmem:[#allocation41_spill] sm:$0xff]  ;;  %v1314_v42 = vpop.permute.xlu0 %1313 }
 0x249   :  { %v1073_v10 = vadd.f32 %v1041_v62, %v753_v51  ;;  %vm226_vm5 = vcmp.eq.s32.totalorder %v2570_v35, %v3287_v44  ;;  %vm243_vm6 = vcmp.eq.s32.totalorder %v2570_v35, %v3288_v57  ;;  %v3300_v62 = vld [vmem:[#allocation113_spill] sm:$0xff]  ;;  %v3311_v44 = vld [vmem:[#allocation86_spill] sm:$0xff] }
 0x24a   :  { %v435_v11 = vsel %vm243_vm6, %v3294_v40, 0.0  ;;  %vm549_vm6 = vcmp.eq.s32.totalorder %v2570_v35, %v3311_v44  ;;  %v3312_v57 = vld [vmem:[#allocation125_spill] sm:$0xff] }
 0x24b   :  { %v709_v63 = vsel %vm549_vm6, %v3315_v15, 0.0  ;;  %v3337_v15 = vld [vmem:[#allocation117_spill] sm:$0xff] }
 0x24c   :  { %v1154_v49 = vpop.permute.xlu1 %1153 }
 0x24d   :  { %vm1200_vm11 = vcmp.eq.s32.totalorder %v2570_v35, %v1154_v49  ;;  %v3289_v49 = vld [vmem:[#allocation123_spill] sm:$0xff] }
 0x24e   :  { %v1360_v37 = vsel %vm1200_vm11, %v1306_v29, 0.0  ;;  %v722_v45 = vsel %vm562_vm3, %v3289_v49, 0.0  ;;  %v3296_v29 = vld [vmem:[#allocation83_spill] sm:$0xff]  ;;  %vm547_vm11 = vcmp.eq.s32.totalorder %v2570_v35, %v3297_v24  ;;  %vm564_vm3 = vcmp.eq.s32.totalorder %v2570_v35, %v3308_v53  ;;  %v3320_v24 = vld [vmem:[#allocation85_spill] sm:$0xff] }
 0x24f   :  { %v1392_v9 = vadd.f32 %v1360_v37, %v1072_v23  ;;  %vm546_vm10 = vcmp.eq.s32.totalorder %v2570_v35, %v3296_v29  ;;  %v754_v32 = vadd.f32 %v722_v45, %v434_v1  ;;  %v707_v6 = vsel %vm547_vm11, %v3300_v62, 0.0  ;;  %v3303_v37 = vld [vmem:[#allocation58_spill] sm:$0xff]  ;;  %v3319_v1 = vld [vmem:[#allocation75_spill] sm:$0xff]  ;;  %v3331_v53 = vld [vmem:[#allocation101_spill] sm:$0xff] }
 0x250   :  { %v1106_v22 = vpop.permute.xlu1 %1105  ;;  %v706_v54 = vsel %vm546_vm10, %v3299_v59, 0.0  ;;  %v418_v23 = vsel %vm226_vm5, %v3303_v37, 0.0  ;;  %v739_v14 = vadd.f32 %v707_v6, %v419_v8  ;;  %vm245_vm5 = vcmp.eq.s32.totalorder %v2570_v35, %v3310_v30  ;;  %v3313_v45 = vld [vmem:[#allocation126_spill] sm:$0xff]  ;;  %v3325_v37 = vld [vmem:[#allocation60_spill] sm:$0xff]  ;;  %v3333_v30 = vld [vmem:[#allocation61_spill] sm:$0xff] }
 0x251   :  { %vm1184_vm0 = vcmp.eq.s32.totalorder %v2570_v35, %v1106_v22  ;;  %v3290_v22 = vld [vmem:[#allocation124_spill] sm:$0xff]  ;;  %v1074_v25 = vadd.f32 %v3302_v43, %v754_v32  ;;  %v738_v12 = vadd.f32 %v706_v54, %v418_v23  ;;  %v724_v49 = vsel %vm564_vm3, %v3312_v57, 0.0  ;;  %v3322_v59 = vld [vmem:[#allocation114_spill] sm:$0xff] }
 0x252   :  { %v1344_v52 = vsel %vm1184_vm0, %v1242_v28, 0.0  ;;  %v723_v38 = vsel %vm563_vm4, %v3290_v22, 0.0  ;;  %vm565_vm4 = vcmp.eq.s32.totalorder %v2570_v35, %v3309_v47  ;;  %vm548_vm10 = vcmp.eq.s32.totalorder %v2570_v35, %v3320_v24  ;;  %v3324_v43 = vld [vmem:[#allocation10_spill] sm:$0xff]  ;;  %v3334_v57 = vld [vmem:[#allocation88_spill] sm:$0xff] }
 0x253   :  { %v1376_v26 = vadd.f32 %v1344_v52, %v1056_v0  ;;  %v755_v58 = vadd.f32 %v723_v38, %v435_v11  ;;  %v725_v22 = vsel %vm565_vm4, %v3313_v45, 0.0  ;;  %v3314_v38 = vld [vmem:[#allocation44_spill] sm:$0xff]  ;;  %v3318_v11 = vld [vmem:[#allocation11_spill] sm:$0xff]  ;;  %vm869_vm11 = vcmp.eq.s32.totalorder %v2570_v35, %v3321_v61  ;;  %v3332_v47 = vld [vmem:[#allocation102_spill] sm:$0xff] }
 0x254   :  { %v1109_v2 = vpop.permute.xlu1 %1108  ;;  %vm244_vm7 = vcmp.eq.s32.totalorder %v2570_v35, %v3314_v38  ;;  %v437_v5 = vsel %vm245_vm5, %v3318_v11, 0.0  ;;  %v708_v54 = vsel %vm548_vm10, %v3322_v59, 0.0  ;;  %vm566_vm4 = vcmp.eq.s32.totalorder %v2570_v35, %v3331_v53  ;;  %v3344_v59 = vld [vmem:[#allocation133_spill] sm:$0xff] }
 0x255   :  { %vm1185_vm1 = vcmp.eq.s32.totalorder %v2570_v35, %v1109_v2  ;;  %v436_v29 = vsel %vm244_vm7, %v3319_v1, 0.0  ;;  %vm567_vm5 = vcmp.eq.s32.totalorder %v2570_v35, %v3332_v47  ;;  %vm551_vm6 = vcmp.eq.s32.totalorder %v2570_v35, %v3334_v57 }
 0x256   :  { %v756_v32 = vadd.f32 %v724_v49, %v436_v29  ;;  %v3335_v49 = vld [vmem:[#allocation127_spill] sm:$0xff] }
 0x257   :  { %v726_v45 = vsel %vm566_vm4, %v3335_v49, 0.0  ;;  %v3342_v29 = vld [vmem:[#allocation139_spill] sm:$0xff] }
 0x258   :  { %v1310_v20 = vpop.permute.xlu1 %1309 }
 0x259   :  { %v1361_v50 = vsel %vm1201_vm15, %v1310_v20, 0.0 }
 0x25a   :  { %v1393_v27 = vadd.f32 %v1361_v50, %v1073_v10  ;;  %v3304_v10 = vld [vmem:[#allocation9_spill] sm:$0xff]  ;;  %v1250_v50 = vpop.permute.xlu0 %1249 }
 0x25b   :  { %v1026_v20 = vsel %vm866_vm12, %v3304_v10, 0.0  ;;  %v3326_v10 = vld [vmem:[#allocation137_spill] sm:$0xff] }
 0x25c   :  { %v1546_v36 = vpack.c.bf16 %v1393_v27, %v1392_v9  ;;  %v1246_v60 = vpop.permute.xlu1 %1245  ;;  %v1058_v9 = vadd.f32 %v1026_v20, %v738_v12  ;;  %v1059_v27 = vadd.f32 %v1027_v34, %v739_v14 }
 0x25d   :  { %v1345_v3 = vsel %vm1185_vm1, %v1246_v60, 0.0  ;;  %vm229_vm1 = vcmp.eq.s32.totalorder %v2570_v35, %v3306_v31  ;;  %v3329_v31 = vld [vmem:[#allocation45_spill] sm:$0xff] }
 0x25e   :  { %v1377_v48 = vadd.f32 %v1345_v3, %v1057_v55  ;;  %1547 = vmatprep.subr.bf16.mxu0 %v1546_v36 }
 0x260   :  { %v1548_v39 = vpack.c.bf16 %v1377_v48, %v1376_v26  ;;  %v1166_v48 = vpop.permute.xlu0 %1165 }
 0x261   :  { %v998_v56 = vpop.permute.xlu1 %997  ;;  %vm1204_vm13 = vcmp.eq.s32.totalorder %v2570_v35, %v1166_v48 }
 0x262   :  { %1549 = vmatpush3.bf16.msra.mxu0 %v1548_v39  ;;  %v1043_v2 = vsel %vm883_vm8, %v998_v56, 0.0 }
 0x263   :  { %v1075_v13 = vadd.f32 %v1043_v2, %v755_v58  ;;  %v757_v58 = vadd.f32 %v725_v22, %v437_v5  ;;  %v3336_v22 = vld [vmem:[#allocation128_spill] sm:$0xff] }
 0x264   :  { %v1121_v56 = vpop.permute.xlu0 %1120  ;;  %v727_v38 = vsel %vm567_vm5, %v3336_v22, 0.0  ;;  %v3341_v5 = vld [vmem:[#allocation12_spill] sm:$0xff] }
 0x266   :  { %v1160_v41 = vpop.permute.xlu1 %1159 }
 0x267   :  { %vm1202_vm9 = vcmp.eq.s32.totalorder %v2570_v35, %v1160_v41 }
 0x268   :  { %v1362_v51 = vsel %vm1202_vm9, %v1314_v42, 0.0  ;;  %v1326_v8 = vpop.permute.xlu0 %1325  ;;  %v3316_v42 = vld [vmem:[#allocation135_spill] sm:$0xff] }
 0x269   :  { %v1394_v33 = vadd.f32 %v1362_v51, %v1074_v25  ;;  %vm885_vm8 = vcmp.eq.s32.totalorder %v2570_v35, %v3316_v42  ;;  %v3323_v51 = vld [vmem:[#allocation7_spill] sm:$0xff]  ;;  %v1076_v25 = vadd.f32 %v3324_v43, %v756_v32  ;;  %v3339_v42 = vld [vmem:[#allocation136_spill] sm:$0xff] }
 0x26a   :  { %v1112_v4 = vpop.permute.xlu1 %1111  ;;  %vm868_vm12 = vcmp.eq.s32.totalorder %v2570_v35, %v3323_v51  ;;  %v3343_v32 = vld [vmem:[#allocation87_spill] sm:$0xff] }
 0x26b   :  { %vm1186_vm15 = vcmp.eq.s32.totalorder %v2570_v35, %v1112_v4  ;;  %v3307_v4 = vld [vmem:[#allocation28_spill] sm:$0xff]  ;;  %v1028_v20 = vsel %vm868_vm12, %v3326_v10, 0.0  ;;  %vm550_vm10 = vcmp.eq.s32.totalorder %v2570_v35, %v3343_v32 }
 0x26c   :  { %v1346_v28 = vsel %vm1186_vm15, %v1250_v50, 0.0  ;;  %vm228_vm2 = vcmp.eq.s32.totalorder %v2570_v35, %v3307_v4  ;;  %v3330_v4 = vld [vmem:[#allocation46_spill] sm:$0xff] }
 0x26d   :  { %v1378_v36 = vadd.f32 %v1346_v28, %v1058_v9  ;;  %v420_v23 = vsel %vm228_vm2, %v3325_v37, 0.0  ;;  %vm247_vm2 = vcmp.eq.s32.totalorder %v2570_v35, %v3329_v31  ;;  %vm246_vm3 = vcmp.eq.s32.totalorder %v2570_v35, %v3330_v4  ;;  %v3347_v37 = vld [vmem:[#allocation62_spill] sm:$0xff] }
 0x26e   :  { %v1115_v19 = vpop.permute.xlu1 %1114  ;;  %v740_v34 = vadd.f32 %v708_v54, %v420_v23  ;;  %v438_v1 = vsel %vm246_vm3, %v3341_v5, 0.0  ;;  %v3345_v54 = vld [vmem:[#allocation116_spill] sm:$0xff] }
 0x26f   :  { %vm1187_vm0 = vcmp.eq.s32.totalorder %v2570_v35, %v1115_v19  ;;  %v3317_v19 = vld [vmem:[#allocation59_spill] sm:$0xff] }
 0x270   :  { %v421_v40 = vsel %vm229_vm1, %v3317_v19, 0.0 }
 0x271   :  { %v741_v62 = vadd.f32 %v709_v63, %v421_v40  ;;  %v711_v63 = vsel %vm551_vm6, %v3337_v15, 0.0  ;;  %v3340_v40 = vld [vmem:[#allocation13_spill] sm:$0xff] }
 0x272   :  { %v1318_v17 = vpop.permute.xlu1 %1317  ;;  %v439_v11 = vsel %vm247_vm2, %v3340_v40, 0.0 }
 0x273   :  { %v1363_v16 = vsel %vm1203_vm14, %v1318_v17, 0.0  ;;  %vm1189_vm14 = vcmp.eq.s32.totalorder %v2570_v35, %v1121_v56  ;;  %v3328_v56 = vld [vmem:[#allocation30_spill] sm:$0xff]  ;;  %v759_v61 = vadd.f32 %v727_v38, %v439_v11 }
 0x274   :  { %v1395_v21 = vadd.f32 %v1363_v16, %v1075_v13  ;;  %v1262_v16 = vpop.permute.xlu0 %1261  ;;  %vm230_vm1 = vcmp.eq.s32.totalorder %v2570_v35, %v3328_v56 }
 0x275   :  { %v1349_v9 = vsel %vm1189_vm14, %v1262_v16, 0.0  ;;  %v422_v23 = vsel %vm230_vm1, %v3347_v37, 0.0 }
 0x276   :  { %v1550_v52 = vpack.c.bf16 %v1395_v21, %v1394_v33  ;;  %v1254_v0 = vpop.permute.xlu1 %1253  ;;  %v1060_v33 = vadd.f32 %v1028_v20, %v740_v34 }
 0x277   :  { %v1347_v55 = vsel %vm1187_vm0, %v1254_v0, 0.0 }
 0x278   :  { %v1379_v60 = vadd.f32 %v1347_v55, %v1059_v27  ;;  %1551 = vmatprep.subr.bf16.mxu0 %v1550_v52 }
 0x27a   :  { %v1552_v3 = vpack.c.bf16 %v1379_v60, %v1378_v36 }
 0x27b   :  { %v1006_v26 = vpop.permute.xlu1 %1005 }
 0x27c   :  { %1553 = vmatpush3.bf16.msra.mxu0 %v1552_v3  ;;  %v1045_v2 = vsel %vm885_vm8, %v1006_v26, 0.0  ;;  %v1172_v3 = vpop.permute.xlu0 %1171  ;;  %vm887_vm8 = vcmp.eq.s32.totalorder %v2570_v35, %v3339_v42 }
 0x27d   :  { %v1077_v13 = vadd.f32 %v1045_v2, %v757_v58  ;;  %v1047_v2 = vsel %vm887_vm8, %v3342_v29, 0.0  ;;  %v758_v58 = vadd.f32 %v726_v45, %v438_v1  ;;  %vm1206_vm12 = vcmp.eq.s32.totalorder %v2570_v35, %v1172_v3 }
 0x27e   :  { %v1079_v43 = vadd.f32 %v1047_v2, %v759_v61 }
 0x27f   :  { %v942_v39 = vpop.permute.xlu1 %941 }
 0x280   :  { %v1029_v6 = vsel %vm869_vm11, %v942_v39, 0.0  ;;  %v1127_v48 = vpop.permute.xlu0 %1126  ;;  %vm871_vm11 = vcmp.eq.s32.totalorder %v2570_v35, %v3344_v59 }
 0x281   :  { %v1061_v12 = vadd.f32 %v1029_v6, %v741_v62  ;;  %v710_v62 = vsel %vm550_vm10, %v3345_v54, 0.0  ;;  %vm1191_vm14 = vcmp.eq.s32.totalorder %v2570_v35, %v1127_v48 }
 0x283   :  { %v1381_v52 = vadd.f32 %v1349_v9, %v1061_v12 }
 0x284   :  { %v1169_v41 = vpop.permute.xlu1 %1168 }
 0x285   :  { %vm1205_vm9 = vcmp.eq.s32.totalorder %v2570_v35, %v1169_v41  ;;  %v3327_v41 = vld [vmem:[#allocation29_spill] sm:$0xff] }
 0x286   :  { %v1365_v46 = vsel %vm1205_vm9, %v1326_v8, 0.0  ;;  %vm231_vm0 = vcmp.eq.s32.totalorder %v2570_v35, %v3327_v41  ;;  %v3338_v8 = vld [vmem:[#allocation134_spill] sm:$0xff] }
 0x287   :  { %v1397_v14 = vadd.f32 %v1365_v46, %v1077_v13  ;;  %v423_v44 = vsel %vm231_vm0, %v3333_v30, 0.0  ;;  %vm886_vm7 = vcmp.eq.s32.totalorder %v2570_v35, %v3338_v8  ;;  %v3346_v13 = vld [vmem:[#allocation131_spill] sm:$0xff] }
 0x288   :  { %v1118_v7 = vpop.permute.xlu1 %1117  ;;  %v743_v6 = vadd.f32 %v711_v63, %v423_v44 }
 0x289   :  { %vm1188_vm15 = vcmp.eq.s32.totalorder %v2570_v35, %v1118_v7  ;;  %v1334_v7 = vpop.permute.xlu0 %1333 }
 0x28c   :  { %v1322_v17 = vpop.permute.xlu1 %1321 }
 0x28d   :  { %v1364_v18 = vsel %vm1204_vm13, %v1322_v17, 0.0  ;;  %vm870_vm13 = vcmp.eq.s32.totalorder %v2570_v35, %v3346_v13  ;;  %v1270_v34 = vpop.permute.xlu0 %1269 }
 0x28e   :  { %v1396_v50 = vadd.f32 %v1364_v18, %v1076_v25  ;;  %v742_v18 = vadd.f32 %v710_v62, %v422_v23 }
 0x290   :  { %v1554_v21 = vpack.c.bf16 %v1397_v14, %v1396_v50  ;;  %v1258_v28 = vpop.permute.xlu1 %1257 }
 0x291   :  { %v1348_v27 = vsel %vm1188_vm15, %v1258_v28, 0.0  ;;  %v1351_v28 = vsel %vm1191_vm14, %v1270_v34, 0.0 }
 0x292   :  { %v1380_v0 = vadd.f32 %v1348_v27, %v1060_v33  ;;  %1555 = vmatprep.subr.bf16.mxu0 %v1554_v21 }
 0x294   :  { %v1556_v55 = vpack.c.bf16 %v1381_v52, %v1380_v0 }
 0x295   :  { %v1010_v36 = vpop.permute.xlu1 %1009 }
 0x296   :  { %1557 = vmatpush3.bf16.msra.mxu0 %v1556_v55  ;;  %v1046_v24 = vsel %vm886_vm7, %v1010_v36, 0.0  ;;  %v1401_v55 = vld [vmem:[%s3013_s0] sm:$0xff] }
 0x297   :  { %v1078_v25 = vadd.f32 %v1046_v24, %v758_v58 }
 0x299   :  { %v946_v60 = vpop.permute.xlu1 %945 }
 0x29a   :  { %v1030_v10 = vsel %vm870_vm13, %v946_v60, 0.0 }
 0x29b   :  { %v1062_v50 = vadd.f32 %v1030_v10, %v742_v18 }
 0x29d   :  { %v950_v26 = vpop.permute.xlu1 %949 }
 0x29e   :  { %v1031_v46 = vsel %vm871_vm11, %v950_v26, 0.0 }
 0x29f   :  { %v1063_v16 = vadd.f32 %v1031_v46, %v743_v6 }
 0x2a1   :  { %v1383_v27 = vadd.f32 %v1351_v28, %v1063_v16 }
 0x2a2   :  { %v1175_v39 = vpop.permute.xlu1 %1174 }
 0x2a3   :  { %vm1207_vm9 = vcmp.eq.s32.totalorder %v2570_v35, %v1175_v39 }
 0x2a4   :  { %v1367_v51 = vsel %vm1207_vm9, %v1334_v7, 0.0 }
 0x2a5   :  { %v1399_v12 = vadd.f32 %v1367_v51, %v1079_v43 }
 0x2a6   :  { %v1124_v19 = vpop.permute.xlu1 %1123 }
 0x2a7   :  { %vm1190_vm15 = vcmp.eq.s32.totalorder %v2570_v35, %v1124_v19 }
 0x2aa   :  { %v1330_v17 = vpop.permute.xlu1 %1329 }
 0x2ab   :  { %v1366_v20 = vsel %vm1206_vm12, %v1330_v17, 0.0 }
 0x2ac   :  { %v1398_v14 = vadd.f32 %v1366_v20, %v1078_v25 }
 0x2ae   :  { %v1558_v33 = vpack.c.bf16 %v1399_v12, %v1398_v14  ;;  %v1266_v21 = vpop.permute.xlu1 %1265 }
 0x2af   :  { %v1350_v9 = vsel %vm1190_vm15, %v1266_v21, 0.0 }
 0x2b0   :  { %v1382_v52 = vadd.f32 %v1350_v9, %v1062_v50  ;;  %1559 = vmatprep.subr.bf16.mxu0 %v1558_v33 }
 0x2b2   :  { %v1560_v0 = vpack.c.bf16 %v1383_v27, %v1382_v52 }
 0x2b4   :  { %1561 = vmatpush3.bf16.msra.mxu0 %v1560_v0 }
 0x2b7   :  { %1468 = vmatmul.mubr.f32.vlgmr.msra.gmra.mrb[0].mxu0 %v1401_v55 }
 0x38a   :  { %v1527_v36 = vpop.f32.mrb[0].mxu0 }
 0x38b   :  { %v1528_v60 = vpop.f32.mrb[1].mxu0 }
 0x38c   :  { %v1529_v3 = vadd.f32 %v1528_v60, %v1527_v36 }
 0x38e   :  { %v1479_v35 = vmul.f32 0.5, %v1529_v3 }
 0x390   :  { %1480 = vst [vmem:[#allocation2] sm:$0xff] %v1479_v35 }
 0x391   :  { %1609 = shalt.err (!%p1606_p4)
}
 0x392   :  { %s1610_s0 = scalar_lea.hbm %s3016_s3, 128 }
 0x393   :  { %p1611_p5 = scmp.ne.s32.totalorder %s3016_s3, %s1610_s0  ;;  %p1614_p6 = scmp.lt.u32.totalorder %s1610_s0, %s3016_s3 }
 0x395   :  { %p1616_p7 = pnand %p1614_p6, %p1611_p5 }
 0x397   :  { %1619 = shalt.err (!%p1616_p7)
}
 0x398   :  { %1490 = dma.vmem_to_hbm [thread:$0]  %s1488_s24, 128, %s3016_s3, [#allocation3]  }
 0x399   :  { %1620 = dma.done.wait [#allocation3], 128  }
 0x39a   :  { %1621 = vsyncadd [#allocation3], 4294967168 }
 0x39b   :  { %1494 = vsyncpa [#allocation3], 1 }

</bundles_post_ra>
